<compile_context>
chip_gen: v7x
topology: tpu7x:2x2x1
jax: 0.10.0
libtpu: 0.0.40
codegen_flags: <defaults>
</compile_context>

<pallas_src>
import functools

import jax
import jax.numpy as jnp
import numpy as np
from jax.experimental import pallas as pl
from jax.experimental.pallas import tpu as pltpu

HEAD_LANES = 128  # fused heads: policy in lanes [0, P), value in lane P, rest 0


def smallresnet_kernel(xflat_ref, wtaps_ref, bconv_ref, w1_ref, b1_ref,
                       w2_ref, b2_ref, wheads_ref, bheads_ref, out_ref,
                       *, H, W, policy_size):
    _, tb, c = xflat_ref.shape           # ((H+2)*(W+2), TB, C) bf16, spatial-major
    hidden = w1_ref.shape[0]
    Wp = W + 2
    # Flattened-padded-row trick: conv_flat[r] = sum_t xflat[r + d_t] @ W_t with
    # d_t = kh*(W+2)+kw.  Rows with (r mod Wp) >= W are halo garbage and are
    # simply skipped by the pooling below.  L = last valid r + 1.
    L = (H - 1) * Wp + W

    wtaps = wtaps_ref[...]               # (9, C, hidden) bf16

    # --- conv_input (3x3, pad=1): 9 accumulating bf16 MXU matmuls, f32 accum.
    conv = None
    for kh in range(3):
        for kw in range(3):
            d = kh * Wp + kw
            xs = xflat_ref[d:d + L, :, :].reshape(L * tb, c)     # contiguous, aligned
            y = jnp.dot(xs, wtaps[kh * 3 + kw],
                        preferred_element_type=jnp.float32)
            conv = y if conv is None else conv + y
    conv = jnp.maximum(conv + bconv_ref[...], 0.0)               # (L*TB, 64) f32

    # --- adaptive_avg_pool2d((1,1)) + flatten: sum the H*W valid row-blocks.
    # TB is a multiple of the sublane tile, so these are pure aligned VPU adds.
    feat = None
    for h in range(H):
        for w in range(W):
            blk = conv[(h * Wp + w) * tb:(h * Wp + w + 1) * tb, :]
            feat = blk if feat is None else feat + blk
    feat = feat * (1.0 / (H * W))                                # (TB, 64)

    # --- res_block: Linear(64,64) -> ReLU -> Linear(64,64), residual add.
    # Weights are stored bf16 (halved HBM/VMEM stream); these matmuls are tiny,
    # so compute/accumulate in f32 for accuracy.
    w1 = w1_ref[...].astype(jnp.float32)
    w2 = w2_ref[...].astype(jnp.float32)
    h1 = jnp.maximum(
        jnp.dot(feat, w1, preferred_element_type=jnp.float32) + b1_ref[...], 0.0)
    res = feat + jnp.dot(h1, w2, preferred_element_type=jnp.float32) + b2_ref[...]

    # --- fused policy + value heads: one (64,128) matmul, lane-dense output.
    wh = wheads_ref[...].astype(jnp.float32)
    heads = jnp.dot(res, wh, preferred_element_type=jnp.float32) + bheads_ref[...]
    lane = jax.lax.broadcasted_iota(jnp.int32, heads.shape, 1)
    is_policy = lane < policy_size

    # softmax(dim=1) restricted to the real policy lanes (padded lanes -> 0).
    masked = jnp.where(is_policy, heads, -jnp.inf)
    m = jnp.max(masked, axis=1, keepdims=True)
    e = jnp.exp(masked - m)                                      # exp(-inf) = 0
    inv = pl.reciprocal(jnp.sum(e, axis=1, keepdims=True), approx=True)  # EUP slot
    policy = e * inv

    # lane P carries tanh(value); policy is 0 on lanes > P, so keep it there.
    out_ref[...] = jnp.where(lane == policy_size, jnp.tanh(heads), policy)


def _round_up(x, m):
    return (x + m - 1) // m * m


def _pick_batch_tile(B, H, W, C, hidden, *, target_rows=1024,
                     vmem_budget_bytes=8 * 1024 * 1024):
    """Batch tile: multiple of 16 (bf16 sublane tile), no divisibility needed
    (wrapper pads B).  VMEM accounting uses the real padded layout
    (sublane tile 16 for bf16 / 8 for f32, lane tile 128).  The default budget
    fits every generation; raise it (and vmem_limit_bytes) on v5e/v6e (128 MiB
    VMEM) for large batches, keep total well under 64 MiB on v7x."""
    hw = H * W
    R = (H + 2) * (W + 2)
    L = (H - 1) * (W + 2) + W

    tb = max(16, _round_up(max(1, target_rows // hw), 16))   # ~target flattened rows
    tb = min(tb, _round_up(B, 16))                           # don't overshoot batch
    if B >= 24:                                              # >= 2 grid steps -> both
        tb = min(tb, _round_up((B + 1) // 2, 16))            # v7x TensorCores get work

    lane_c = _round_up(C, 128)
    lane_h = _round_up(hidden, 128)

    def footprint(t):
        xpad = R * _round_up(t, 16) * lane_c * 2             # bf16 input tile
        conv = L * _round_up(t, 8) * lane_h * 4              # f32 conv accumulator
        taps = L * _round_up(t, 16) * lane_c * 2             # materialized tap slice
        outb = _round_up(t, 8) * HEAD_LANES * 4
        return 2 * xpad + 2 * conv + 2 * taps + 2 * outb + (2 << 20)  # dbl-buf + slack

    while tb > 16 and footprint(tb) > vmem_budget_bytes:
        tb -= 16
    return tb


def pack_kernel_params(params):
    """Kernel-layout params: per-tap conv weights (bf16) + fused lane-dense heads."""
    hidden = params['w1'].shape[0]
    P = params['wp'].shape[1]
    assert P + 1 <= HEAD_LANES

    # tap index = kh*3 + kw, each tap is (C, hidden)
    wtaps = jnp.transpose(params['wconv_oihw'], (2, 3, 1, 0)).reshape(9, -1, hidden)

    wheads = jnp.zeros((hidden, HEAD_LANES), jnp.float32)
    wheads = wheads.at[:, :P].set(params['wp']).at[:, P:P + 1].set(params['wv'])
    bheads = jnp.zeros((1, HEAD_LANES), jnp.float32)
    bheads = bheads.at[:, :P].set(params['bp']).at[:, P:P + 1].set(params['bv'])

    return {
        'wtaps': wtaps.astype(jnp.bfloat16), 'bconv': params['bconv'],
        'w1': params['w1'].astype(jnp.bfloat16), 'b1': params['b1'],
        'w2': params['w2'].astype(jnp.bfloat16), 'b2': params['b2'],
        'wheads': wheads.astype(jnp.bfloat16), 'bheads': bheads,
    }


def small_resnet_forward(x, params, *, vmem_budget_bytes=8 * 1024 * 1024,
                         vmem_limit_bytes=32 * 1024 * 1024):
    """x: (B, C, H, W) float32 (NCHW). Returns (policy (B, P), value (B, 1))."""
    B, C, H, W = x.shape
    hidden = params['w1'].shape[0]
    P = params['wp'].shape[1]
    HW = H * W
    R = (H + 2) * (W + 2)

    kp = pack_kernel_params(params)

    TB = _pick_batch_tile(B, H, W, C, hidden, vmem_budget_bytes=vmem_budget_bytes)
    Bp = _round_up(B, TB)
    grid = (Bp // TB,)

    # In-kernel im2col input: spatial-major, batch-innermost, zero halo, bf16.
    xsp = jnp.transpose(x, (2, 3, 0, 1))                       # (H, W, B, C)
    xsp = jnp.pad(xsp, ((1, 1), (1, 1), (0, Bp - B), (0, 0)))
    xsp = xsp.reshape(R, Bp, C).astype(jnp.bfloat16)           # ((H+2)(W+2), Bp, C)

    kernel = functools.partial(smallresnet_kernel, H=H, W=W, policy_size=P)

    flops = Bp * HW * 2 * 9 * C * hidden + Bp * 2 * hidden * (2 * hidden + HEAD_LANES)
    bytes_accessed = (xsp.size * 2 + Bp * HEAD_LANES * 4
                      + sum(int(v.size) * v.dtype.itemsize for v in kp.values()))

    out = pl.pallas_call(
        kernel,
        out_shape=jax.ShapeDtypeStruct((Bp, HEAD_LANES), jnp.float32),
        grid=grid,
        in_specs=[
            pl.BlockSpec((R, TB, C), lambda i: (0, i, 0)),          # padded input
            pl.BlockSpec((9, C, hidden), lambda i: (0, 0, 0)),      # per-tap conv W
            pl.BlockSpec((1, hidden), lambda i: (0, 0)),            # conv bias
            pl.BlockSpec((hidden, hidden), lambda i: (0, 0)),       # w1
            pl.BlockSpec((1, hidden), lambda i: (0, 0)),            # b1
            pl.BlockSpec((hidden, hidden), lambda i: (0, 0)),       # w2
            pl.BlockSpec((1, hidden), lambda i: (0, 0)),            # b2
            pl.BlockSpec((hidden, HEAD_LANES), lambda i: (0, 0)),   # fused heads W
            pl.BlockSpec((1, HEAD_LANES), lambda i: (0, 0)),        # fused heads b
        ],
        out_specs=pl.BlockSpec((TB, HEAD_LANES), lambda i: (i, 0)),
        compiler_params=pltpu.CompilerParams(
            dimension_semantics=("parallel",),
            vmem_limit_bytes=vmem_limit_bytes),
        cost_estimate=pl.CostEstimate(
            flops=int(flops),
            transcendentals=int(Bp * 2 * HEAD_LANES),
            bytes_accessed=int(bytes_accessed)),
    )(xsp, kp['wtaps'], kp['bconv'], kp['w1'], kp['b1'], kp['w2'], kp['b2'],
      kp['wheads'], kp['bheads'])

    return out[:B, :P], out[:B, P:P + 1]


def init_params(key, input_channels=3, policy_size=9, hidden=64):
    """Deterministic synthetic params mirroring the PyTorch module's shapes (f32)."""
    ks = jax.random.split(key, 5)

    def linear(k, fan_in, fan_out):
        bound = 1.0 / np.sqrt(fan_in)
        kw_, kb_ = jax.random.split(k)
        w = jax.random.uniform(kw_, (fan_in, fan_out), jnp.float32, -bound, bound)
        b = jax.random.uniform(kb_, (1, fan_out), jnp.float32, -bound, bound)
        return w, b

    ckk = input_channels * 9
    bound = 1.0 / np.sqrt(ckk)
    kcw, kcb = jax.random.split(ks[0])
    wconv_oihw = jax.random.uniform(kcw, (hidden, input_channels, 3, 3),
                                    jnp.float32, -bound, bound)
    bconv = jax.random.uniform(kcb, (1, hidden), jnp.float32, -bound, bound)

    w1, b1 = linear(ks[1], hidden, hidden)
    w2, b2 = linear(ks[2], hidden, hidden)
    wp, bp = linear(ks[3], hidden, policy_size)
    wv, bv = linear(ks[4], hidden, 1)

    # TODO(synk): flat_fc (flat 2-D input path) and the dynamically created
    # nn.Linear used when pooled features != 64 are dead on the default
    # 4-D / 64-channel conv path and are not implemented here.
    return {'wconv_oihw': wconv_oihw, 'bconv': bconv,
            'w1': w1, 'b1': b1, 'w2': w2, 'b2': b2,
            'wp': wp, 'bp': bp, 'wv': wv, 'bv': bv}


def reference_forward(x, params):
    """Pure-JAX reference matching the PyTorch forward (conv path).  Matmul
    weights and x are rounded to bf16 to mirror the kernel's MXU inputs."""
    q = lambda a: a.astype(jnp.bfloat16).astype(jnp.float32)
    conv = jax.lax.conv_general_dilated(
        q(x), q(params['wconv_oihw']), (1, 1), 'SAME',
        dimension_numbers=('NCHW', 'OIHW', 'NCHW'))
    conv = jax.nn.relu(conv + params['bconv'].reshape(1, -1, 1, 1))
    feat = jnp.mean(conv, axis=(2, 3))
    h = jax.nn.relu(feat @ q(params['w1']) + params['b1'])
    res = feat + h @ q(params['w2']) + params['b2']
    policy = jax.nn.softmax(res @ q(params['wp']) + params['bp'], axis=1)
    value = jnp.tanh(res @ q(params['wv']) + params['bv'])
    return policy, value


if __name__ == "__main__":
    key = jax.random.PRNGKey(0)
    kx, kp = jax.random.split(key)

    # TicTacToe-like defaults (3 channels, 3x3 board, 9-way policy).  B=30 is
    # small but exercises the divisibility-free batch padding and a grid of
    # >= 2 steps (both TensorCores on v7x).
    B, C, H, W = 30, 3, 3, 3
    policy_size = 9
    x = jax.random.normal(kx, (B, C, H, W), dtype=jnp.float32)
    params = init_params(kp, input_channels=C, policy_size=policy_size)

    policy, value = small_resnet_forward(x, params)
    policy, value = jax.block_until_ready((policy, value))

    ref_policy, ref_value = reference_forward(x, params)
    # Tolerance reflects bf16 MXU inputs + approximate reciprocal in the softmax.
    np.testing.assert_allclose(np.asarray(policy), np.asarray(ref_policy),
                               rtol=1e-2, atol=1e-2)
    np.testing.assert_allclose(np.asarray(value), np.asarray(ref_value),
                               rtol=1e-2, atol=1e-2)
    assert policy.shape == (B, policy_size) and value.shape == (B, 1)

    print("KERNEL_OK")
</pallas_src>

<mosaic_0001>
module attributes {stable_mosaic.version = 11 : i64} {
  func.func @smallresnet_kernel(%arg0: i32, %arg1: memref<25x16x3xbf16, #tpu.memory_space<vmem>>, %arg2: memref<9x3x64xbf16, #tpu.memory_space<vmem>>, %arg3: memref<1x64xf32, #tpu.memory_space<vmem>>, %arg4: memref<64x64xbf16, #tpu.memory_space<vmem>>, %arg5: memref<1x64xf32, #tpu.memory_space<vmem>>, %arg6: memref<64x64xbf16, #tpu.memory_space<vmem>>, %arg7: memref<1x64xf32, #tpu.memory_space<vmem>>, %arg8: memref<64x128xbf16, #tpu.memory_space<vmem>>, %arg9: memref<1x128xf32, #tpu.memory_space<vmem>>, %arg10: memref<16x128xf32, #tpu.memory_space<vmem>>) attributes {dimension_semantics = [#tpu.dimension_semantics<parallel>], iteration_bounds = array<i64: 2>, scalar_prefetch = 0 : i64, scratch_operands = 0 : i64, tpu.core_type = #tpu.core_type<tc>, window_params = [{transform_indices = @transform_0, window_bounds = array<i64: 25, 16, 3>}, {pipeline_mode = #tpu.pipeline_mode<synchronous>, transform_indices = @transform_1, window_bounds = array<i64: 9, 3, 64>}, {pipeline_mode = #tpu.pipeline_mode<synchronous>, transform_indices = @transform_2, window_bounds = array<i64: 1, 64>}, {pipeline_mode = #tpu.pipeline_mode<synchronous>, transform_indices = @transform_3, window_bounds = array<i64: 64, 64>}, {pipeline_mode = #tpu.pipeline_mode<synchronous>, transform_indices = @transform_4, window_bounds = array<i64: 1, 64>}, {pipeline_mode = #tpu.pipeline_mode<synchronous>, transform_indices = @transform_5, window_bounds = array<i64: 64, 64>}, {pipeline_mode = #tpu.pipeline_mode<synchronous>, transform_indices = @transform_6, window_bounds = array<i64: 1, 64>}, {pipeline_mode = #tpu.pipeline_mode<synchronous>, transform_indices = @transform_7, window_bounds = array<i64: 64, 128>}, {pipeline_mode = #tpu.pipeline_mode<synchronous>, transform_indices = @transform_8, window_bounds = array<i64: 1, 128>}, {transform_indices = @transform_9, window_bounds = array<i64: 16, 128>}]} {
    %c0 = arith.constant 0 : index
    %c0_0 = arith.constant 0 : index
    %c0_1 = arith.constant 0 : index
    %0 = vector.load %arg2[%c0, %c0_0, %c0_1] : memref<9x3x64xbf16, #tpu.memory_space<vmem>>, vector<9x3x64xbf16>
    %c0_2 = arith.constant 0 : index
    %c0_3 = arith.constant 0 : index
    %c0_4 = arith.constant 0 : index
    %1 = vector.load %arg1[%c0_2, %c0_3, %c0_4] : memref<25x16x3xbf16, #tpu.memory_space<vmem>>, vector<13x16x3xbf16>
    %2 = vector.shape_cast %1 : vector<13x16x3xbf16> to vector<208x3xbf16>
    %3 = vector.extract_strided_slice %0 {offsets = [0, 0, 0], sizes = [1, 3, 64], strides = [1, 1, 1]} : vector<9x3x64xbf16> to vector<1x3x64xbf16>
    %4 = vector.shape_cast %3 : vector<1x3x64xbf16> to vector<3x64xbf16>
    %cst = arith.constant dense<0.000000e+00> : vector<208x64xf32>
    %5 = tpu.matmul %2, %4, %cst {dimension_numbers = #tpu.dot_dimension_numbers<[1], [0], [0], [1], [0, 0, 1, 1], [], []>} : vector<208x3xbf16>, vector<3x64xbf16>, vector<208x64xf32> -> vector<208x64xf32>
    %c1 = arith.constant 1 : index
    %c0_5 = arith.constant 0 : index
    %c0_6 = arith.constant 0 : index
    %6 = vector.load %arg1[%c1, %c0_5, %c0_6] : memref<25x16x3xbf16, #tpu.memory_space<vmem>>, vector<13x16x3xbf16>
    %7 = vector.shape_cast %6 : vector<13x16x3xbf16> to vector<208x3xbf16>
    %8 = vector.extract_strided_slice %0 {offsets = [1, 0, 0], sizes = [1, 3, 64], strides = [1, 1, 1]} : vector<9x3x64xbf16> to vector<1x3x64xbf16>
    %9 = vector.shape_cast %8 : vector<1x3x64xbf16> to vector<3x64xbf16>
    %cst_7 = arith.constant dense<0.000000e+00> : vector<208x64xf32>
    %10 = tpu.matmul %7, %9, %cst_7 {dimension_numbers = #tpu.dot_dimension_numbers<[1], [0], [0], [1], [0, 0, 1, 1], [], []>} : vector<208x3xbf16>, vector<3x64xbf16>, vector<208x64xf32> -> vector<208x64xf32>
    %11 = arith.addf %5, %10 : vector<208x64xf32>
    %c2 = arith.constant 2 : index
    %c0_8 = arith.constant 0 : index
    %c0_9 = arith.constant 0 : index
    %12 = vector.load %arg1[%c2, %c0_8, %c0_9] : memref<25x16x3xbf16, #tpu.memory_space<vmem>>, vector<13x16x3xbf16>
    %13 = vector.shape_cast %12 : vector<13x16x3xbf16> to vector<208x3xbf16>
    %14 = vector.extract_strided_slice %0 {offsets = [2, 0, 0], sizes = [1, 3, 64], strides = [1, 1, 1]} : vector<9x3x64xbf16> to vector<1x3x64xbf16>
    %15 = vector.shape_cast %14 : vector<1x3x64xbf16> to vector<3x64xbf16>
    %cst_10 = arith.constant dense<0.000000e+00> : vector<208x64xf32>
    %16 = tpu.matmul %13, %15, %cst_10 {dimension_numbers = #tpu.dot_dimension_numbers<[1], [0], [0], [1], [0, 0, 1, 1], [], []>} : vector<208x3xbf16>, vector<3x64xbf16>, vector<208x64xf32> -> vector<208x64xf32>
    %17 = arith.addf %11, %16 : vector<208x64xf32>
    %c5 = arith.constant 5 : index
    %c0_11 = arith.constant 0 : index
    %c0_12 = arith.constant 0 : index
    %18 = vector.load %arg1[%c5, %c0_11, %c0_12] : memref<25x16x3xbf16, #tpu.memory_space<vmem>>, vector<13x16x3xbf16>
    %19 = vector.shape_cast %18 : vector<13x16x3xbf16> to vector<208x3xbf16>
    %20 = vector.extract_strided_slice %0 {offsets = [3, 0, 0], sizes = [1, 3, 64], strides = [1, 1, 1]} : vector<9x3x64xbf16> to vector<1x3x64xbf16>
    %21 = vector.shape_cast %20 : vector<1x3x64xbf16> to vector<3x64xbf16>
    %cst_13 = arith.constant dense<0.000000e+00> : vector<208x64xf32>
    %22 = tpu.matmul %19, %21, %cst_13 {dimension_numbers = #tpu.dot_dimension_numbers<[1], [0], [0], [1], [0, 0, 1, 1], [], []>} : vector<208x3xbf16>, vector<3x64xbf16>, vector<208x64xf32> -> vector<208x64xf32>
    %23 = arith.addf %17, %22 : vector<208x64xf32>
    %c6 = arith.constant 6 : index
    %c0_14 = arith.constant 0 : index
    %c0_15 = arith.constant 0 : index
    %24 = vector.load %arg1[%c6, %c0_14, %c0_15] : memref<25x16x3xbf16, #tpu.memory_space<vmem>>, vector<13x16x3xbf16>
    %25 = vector.shape_cast %24 : vector<13x16x3xbf16> to vector<208x3xbf16>
    %26 = vector.extract_strided_slice %0 {offsets = [4, 0, 0], sizes = [1, 3, 64], strides = [1, 1, 1]} : vector<9x3x64xbf16> to vector<1x3x64xbf16>
    %27 = vector.shape_cast %26 : vector<1x3x64xbf16> to vector<3x64xbf16>
    %cst_16 = arith.constant dense<0.000000e+00> : vector<208x64xf32>
    %28 = tpu.matmul %25, %27, %cst_16 {dimension_numbers = #tpu.dot_dimension_numbers<[1], [0], [0], [1], [0, 0, 1, 1], [], []>} : vector<208x3xbf16>, vector<3x64xbf16>, vector<208x64xf32> -> vector<208x64xf32>
    %29 = arith.addf %23, %28 : vector<208x64xf32>
    %c7 = arith.constant 7 : index
    %c0_17 = arith.constant 0 : index
    %c0_18 = arith.constant 0 : index
    %30 = vector.load %arg1[%c7, %c0_17, %c0_18] : memref<25x16x3xbf16, #tpu.memory_space<vmem>>, vector<13x16x3xbf16>
    %31 = vector.shape_cast %30 : vector<13x16x3xbf16> to vector<208x3xbf16>
    %32 = vector.extract_strided_slice %0 {offsets = [5, 0, 0], sizes = [1, 3, 64], strides = [1, 1, 1]} : vector<9x3x64xbf16> to vector<1x3x64xbf16>
    %33 = vector.shape_cast %32 : vector<1x3x64xbf16> to vector<3x64xbf16>
    %cst_19 = arith.constant dense<0.000000e+00> : vector<208x64xf32>
    %34 = tpu.matmul %31, %33, %cst_19 {dimension_numbers = #tpu.dot_dimension_numbers<[1], [0], [0], [1], [0, 0, 1, 1], [], []>} : vector<208x3xbf16>, vector<3x64xbf16>, vector<208x64xf32> -> vector<208x64xf32>
    %35 = arith.addf %29, %34 : vector<208x64xf32>
    %c10 = arith.constant 10 : index
    %c0_20 = arith.constant 0 : index
    %c0_21 = arith.constant 0 : index
    %36 = vector.load %arg1[%c10, %c0_20, %c0_21] : memref<25x16x3xbf16, #tpu.memory_space<vmem>>, vector<13x16x3xbf16>
    %37 = vector.shape_cast %36 : vector<13x16x3xbf16> to vector<208x3xbf16>
    %38 = vector.extract_strided_slice %0 {offsets = [6, 0, 0], sizes = [1, 3, 64], strides = [1, 1, 1]} : vector<9x3x64xbf16> to vector<1x3x64xbf16>
    %39 = vector.shape_cast %38 : vector<1x3x64xbf16> to vector<3x64xbf16>
    %cst_22 = arith.constant dense<0.000000e+00> : vector<208x64xf32>
    %40 = tpu.matmul %37, %39, %cst_22 {dimension_numbers = #tpu.dot_dimension_numbers<[1], [0], [0], [1], [0, 0, 1, 1], [], []>} : vector<208x3xbf16>, vector<3x64xbf16>, vector<208x64xf32> -> vector<208x64xf32>
    %41 = arith.addf %35, %40 : vector<208x64xf32>
    %c11 = arith.constant 11 : index
    %c0_23 = arith.constant 0 : index
    %c0_24 = arith.constant 0 : index
    %42 = vector.load %arg1[%c11, %c0_23, %c0_24] : memref<25x16x3xbf16, #tpu.memory_space<vmem>>, vector<13x16x3xbf16>
    %43 = vector.shape_cast %42 : vector<13x16x3xbf16> to vector<208x3xbf16>
    %44 = vector.extract_strided_slice %0 {offsets = [7, 0, 0], sizes = [1, 3, 64], strides = [1, 1, 1]} : vector<9x3x64xbf16> to vector<1x3x64xbf16>
    %45 = vector.shape_cast %44 : vector<1x3x64xbf16> to vector<3x64xbf16>
    %cst_25 = arith.constant dense<0.000000e+00> : vector<208x64xf32>
    %46 = tpu.matmul %43, %45, %cst_25 {dimension_numbers = #tpu.dot_dimension_numbers<[1], [0], [0], [1], [0, 0, 1, 1], [], []>} : vector<208x3xbf16>, vector<3x64xbf16>, vector<208x64xf32> -> vector<208x64xf32>
    %47 = arith.addf %41, %46 : vector<208x64xf32>
    %c12 = arith.constant 12 : index
    %c0_26 = arith.constant 0 : index
    %c0_27 = arith.constant 0 : index
    %48 = vector.load %arg1[%c12, %c0_26, %c0_27] : memref<25x16x3xbf16, #tpu.memory_space<vmem>>, vector<13x16x3xbf16>
    %49 = vector.shape_cast %48 : vector<13x16x3xbf16> to vector<208x3xbf16>
    %50 = vector.extract_strided_slice %0 {offsets = [8, 0, 0], sizes = [1, 3, 64], strides = [1, 1, 1]} : vector<9x3x64xbf16> to vector<1x3x64xbf16>
    %51 = vector.shape_cast %50 : vector<1x3x64xbf16> to vector<3x64xbf16>
    %cst_28 = arith.constant dense<0.000000e+00> : vector<208x64xf32>
    %52 = tpu.matmul %49, %51, %cst_28 {dimension_numbers = #tpu.dot_dimension_numbers<[1], [0], [0], [1], [0, 0, 1, 1], [], []>} : vector<208x3xbf16>, vector<3x64xbf16>, vector<208x64xf32> -> vector<208x64xf32>
    %53 = arith.addf %47, %52 : vector<208x64xf32>
    %c0_29 = arith.constant 0 : index
    %c0_30 = arith.constant 0 : index
    %54 = vector.load %arg3[%c0_29, %c0_30] : memref<1x64xf32, #tpu.memory_space<vmem>>, vector<1x64xf32>
    %55 = vector.broadcast %54 : vector<1x64xf32> to vector<208x64xf32>
    %56 = arith.addf %53, %55 : vector<208x64xf32>
    %cst_31 = arith.constant 0.000000e+00 : f32
    %57 = vector.broadcast %cst_31 : f32 to vector<208x64xf32>
    %58 = arith.maximumf %56, %57 : vector<208x64xf32>
    %59 = vector.extract_strided_slice %58 {offsets = [0, 0], sizes = [16, 64], strides = [1, 1]} : vector<208x64xf32> to vector<16x64xf32>
    %60 = vector.extract_strided_slice %58 {offsets = [16, 0], sizes = [16, 64], strides = [1, 1]} : vector<208x64xf32> to vector<16x64xf32>
    %61 = arith.addf %59, %60 : vector<16x64xf32>
    %62 = vector.extract_strided_slice %58 {offsets = [32, 0], sizes = [16, 64], strides = [1, 1]} : vector<208x64xf32> to vector<16x64xf32>
    %63 = arith.addf %61, %62 : vector<16x64xf32>
    %64 = vector.extract_strided_slice %58 {offsets = [80, 0], sizes = [16, 64], strides = [1, 1]} : vector<208x64xf32> to vector<16x64xf32>
    %65 = arith.addf %63, %64 : vector<16x64xf32>
    %66 = vector.extract_strided_slice %58 {offsets = [96, 0], sizes = [16, 64], strides = [1, 1]} : vector<208x64xf32> to vector<16x64xf32>
    %67 = arith.addf %65, %66 : vector<16x64xf32>
    %68 = vector.extract_strided_slice %58 {offsets = [112, 0], sizes = [16, 64], strides = [1, 1]} : vector<208x64xf32> to vector<16x64xf32>
    %69 = arith.addf %67, %68 : vector<16x64xf32>
    %70 = vector.extract_strided_slice %58 {offsets = [160, 0], sizes = [16, 64], strides = [1, 1]} : vector<208x64xf32> to vector<16x64xf32>
    %71 = arith.addf %69, %70 : vector<16x64xf32>
    %72 = vector.extract_strided_slice %58 {offsets = [176, 0], sizes = [16, 64], strides = [1, 1]} : vector<208x64xf32> to vector<16x64xf32>
    %73 = arith.addf %71, %72 : vector<16x64xf32>
    %74 = vector.extract_strided_slice %58 {offsets = [192, 0], sizes = [16, 64], strides = [1, 1]} : vector<208x64xf32> to vector<16x64xf32>
    %75 = arith.addf %73, %74 : vector<16x64xf32>
    %cst_32 = arith.constant 0.111111112 : f32
    %76 = vector.broadcast %cst_32 : f32 to vector<16x64xf32>
    %77 = arith.mulf %75, %76 : vector<16x64xf32>
    %c0_33 = arith.constant 0 : index
    %c0_34 = arith.constant 0 : index
    %78 = vector.load %arg4[%c0_33, %c0_34] : memref<64x64xbf16, #tpu.memory_space<vmem>>, vector<64x64xbf16>
    %79 = arith.extf %78 : vector<64x64xbf16> to vector<64x64xf32>
    %c0_35 = arith.constant 0 : index
    %c0_36 = arith.constant 0 : index
    %80 = vector.load %arg6[%c0_35, %c0_36] : memref<64x64xbf16, #tpu.memory_space<vmem>>, vector<64x64xbf16>
    %81 = arith.extf %80 : vector<64x64xbf16> to vector<64x64xf32>
    %cst_37 = arith.constant dense<0.000000e+00> : vector<16x64xf32>
    %82 = tpu.matmul %77, %79, %cst_37 {dimension_numbers = #tpu.dot_dimension_numbers<[1], [0], [0], [1], [0, 0, 1, 1], [], []>} : vector<16x64xf32>, vector<64x64xf32>, vector<16x64xf32> -> vector<16x64xf32>
    %c0_38 = arith.constant 0 : index
    %c0_39 = arith.constant 0 : index
    %83 = vector.load %arg5[%c0_38, %c0_39] : memref<1x64xf32, #tpu.memory_space<vmem>>, vector<1x64xf32>
    %84 = vector.broadcast %83 : vector<1x64xf32> to vector<16x64xf32>
    %85 = arith.addf %82, %84 : vector<16x64xf32>
    %cst_40 = arith.constant 0.000000e+00 : f32
    %86 = vector.broadcast %cst_40 : f32 to vector<16x64xf32>
    %87 = arith.maximumf %85, %86 : vector<16x64xf32>
    %cst_41 = arith.constant dense<0.000000e+00> : vector<16x64xf32>
    %88 = tpu.matmul %87, %81, %cst_41 {dimension_numbers = #tpu.dot_dimension_numbers<[1], [0], [0], [1], [0, 0, 1, 1], [], []>} : vector<16x64xf32>, vector<64x64xf32>, vector<16x64xf32> -> vector<16x64xf32>
    %89 = arith.addf %77, %88 : vector<16x64xf32>
    %c0_42 = arith.constant 0 : index
    %c0_43 = arith.constant 0 : index
    %90 = vector.load %arg7[%c0_42, %c0_43] : memref<1x64xf32, #tpu.memory_space<vmem>>, vector<1x64xf32>
    %91 = vector.broadcast %90 : vector<1x64xf32> to vector<16x64xf32>
    %92 = arith.addf %89, %91 : vector<16x64xf32>
    %c0_44 = arith.constant 0 : index
    %c0_45 = arith.constant 0 : index
    %93 = vector.load %arg8[%c0_44, %c0_45] : memref<64x128xbf16, #tpu.memory_space<vmem>>, vector<64x128xbf16>
    %94 = arith.extf %93 : vector<64x128xbf16> to vector<64x128xf32>
    %cst_46 = arith.constant dense<0.000000e+00> : vector<16x128xf32>
    %95 = tpu.matmul %92, %94, %cst_46 {dimension_numbers = #tpu.dot_dimension_numbers<[1], [0], [0], [1], [0, 0, 1, 1], [], []>} : vector<16x64xf32>, vector<64x128xf32>, vector<16x128xf32> -> vector<16x128xf32>
    %c0_47 = arith.constant 0 : index
    %c0_48 = arith.constant 0 : index
    %96 = vector.load %arg9[%c0_47, %c0_48] : memref<1x128xf32, #tpu.memory_space<vmem>>, vector<1x128xf32>
    %97 = vector.broadcast %96 : vector<1x128xf32> to vector<16x128xf32>
    %98 = arith.addf %95, %97 : vector<16x128xf32>
    %99 = tpu.iota {dimensions = array<i32: 1>} : vector<16x128xi32>
    %c9_i32 = arith.constant 9 : i32
    %100 = vector.broadcast %c9_i32 : i32 to vector<16x128xi32>
    %101 = arith.cmpi slt, %99, %100 : vector<16x128xi32>
    %cst_49 = arith.constant 0xFF800000 : f32
    %102 = vector.broadcast %cst_49 : f32 to vector<16x128xf32>
    %103 = arith.select %101, %98, %102 : vector<16x128xi1>, vector<16x128xf32>
    %cst_50 = arith.constant dense<0xFF800000> : vector<16xf32>
    %104 = vector.multi_reduction <maximumf>, %103, %cst_50 [1] : vector<16x128xf32> to vector<16xf32>
    %105 = vector.shape_cast %104 : vector<16xf32> to vector<16x1xf32>
    %106 = vector.broadcast %105 : vector<16x1xf32> to vector<16x128xf32>
    %107 = arith.subf %103, %106 : vector<16x128xf32>
    %108 = math.exp %107 : vector<16x128xf32>
    %cst_51 = arith.constant dense<0.000000e+00> : vector<16xf32>
    %109 = vector.multi_reduction <add>, %108, %cst_51 [1] : vector<16x128xf32> to vector<16xf32>
    %110 = vector.shape_cast %109 : vector<16xf32> to vector<16x1xf32>
    %111 = tpu.reciprocal %110 {approx = true} : vector<16x1xf32> -> vector<16x1xf32>
    %112 = vector.broadcast %111 : vector<16x1xf32> to vector<16x128xf32>
    %113 = arith.mulf %108, %112 : vector<16x128xf32>
    %c9_i32_52 = arith.constant 9 : i32
    %114 = vector.broadcast %c9_i32_52 : i32 to vector<16x128xi32>
    %115 = arith.cmpi eq, %99, %114 : vector<16x128xi32>
    %116 = math.tanh %98 : vector<16x128xf32>
    %117 = arith.select %115, %116, %113 : vector<16x128xi1>, vector<16x128xf32>
    %c0_53 = arith.constant 0 : index
    %c0_54 = arith.constant 0 : index
    %118 = vector.load %arg10[%c0_53, %c0_54] : memref<16x128xf32, #tpu.memory_space<vmem>>, vector<16x128xf32>
    tpu.vector_store %arg10[%c0_53, %c0_54], %117 {strides = array<i32>} : memref<16x128xf32, #tpu.memory_space<vmem>>, vector<16x128xf32>,
    return
  }
  func.func @transform_0(%arg0: i32) -> (i32, i32, i32) {
    %c0_i32 = arith.constant 0 : i32
    %c0_i32_0 = arith.constant 0 : i32
    %c0_i32_1 = arith.constant 0 : i32
    return %c0_i32, %arg0, %c0_i32_0 : i32, i32, i32
  }
  func.func @transform_1(%arg0: i32) -> (i32, i32, i32) {
    %c0_i32 = arith.constant 0 : i32
    %c0_i32_0 = arith.constant 0 : i32
    %c0_i32_1 = arith.constant 0 : i32
    %c0_i32_2 = arith.constant 0 : i32
    return %c0_i32, %c0_i32_0, %c0_i32_1 : i32, i32, i32
  }
  func.func @transform_2(%arg0: i32) -> (i32, i32) {
    %c0_i32 = arith.constant 0 : i32
    %c0_i32_0 = arith.constant 0 : i32
    %c0_i32_1 = arith.constant 0 : i32
    return %c0_i32, %c0_i32_0 : i32, i32
  }
  func.func @transform_3(%arg0: i32) -> (i32, i32) {
    %c0_i32 = arith.constant 0 : i32
    %c0_i32_0 = arith.constant 0 : i32
    %c0_i32_1 = arith.constant 0 : i32
    return %c0_i32, %c0_i32_0 : i32, i32
  }
  func.func @transform_4(%arg0: i32) -> (i32, i32) {
    %c0_i32 = arith.constant 0 : i32
    %c0_i32_0 = arith.constant 0 : i32
    %c0_i32_1 = arith.constant 0 : i32
    return %c0_i32, %c0_i32_0 : i32, i32
  }
  func.func @transform_5(%arg0: i32) -> (i32, i32) {
    %c0_i32 = arith.constant 0 : i32
    %c0_i32_0 = arith.constant 0 : i32
    %c0_i32_1 = arith.constant 0 : i32
    return %c0_i32, %c0_i32_0 : i32, i32
  }
  func.func @transform_6(%arg0: i32) -> (i32, i32) {
    %c0_i32 = arith.constant 0 : i32
    %c0_i32_0 = arith.constant 0 : i32
    %c0_i32_1 = arith.constant 0 : i32
    return %c0_i32, %c0_i32_0 : i32, i32
  }
  func.func @transform_7(%arg0: i32) -> (i32, i32) {
    %c0_i32 = arith.constant 0 : i32
    %c0_i32_0 = arith.constant 0 : i32
    %c0_i32_1 = arith.constant 0 : i32
    return %c0_i32, %c0_i32_0 : i32, i32
  }
  func.func @transform_8(%arg0: i32) -> (i32, i32) {
    %c0_i32 = arith.constant 0 : i32
    %c0_i32_0 = arith.constant 0 : i32
    %c0_i32_1 = arith.constant 0 : i32
    return %c0_i32, %c0_i32_0 : i32, i32
  }
  func.func @transform_9(%arg0: i32) -> (i32, i32) {
    %c0_i32 = arith.constant 0 : i32
    %c0_i32_0 = arith.constant 0 : i32
    return %arg0, %c0_i32 : i32, i32
  }
}

</mosaic_0001>

<bundles_post_ra>
// kernel: tpu_custom_call.1
= control target key start
LH: loop header
LB: loop body
LE: loop exit
PB: predicated region body
PF: predicated region fallthrough
CT: control target
= control target key end

     0   :  { %14 = vsyncpa [#allocation4], 0  ;;  %s6259_s0 = inlined_call_operand.vmem [shape: bf16[25,32,3], index: 0, kind: input, shape index: {}]   ;;  %s6260_s1 = inlined_call_operand.vmem [shape: bf16[9,3,64], index: 1, kind: input, shape index: {}]   ;;  %s6261_s2 = inlined_call_operand.vmem [shape: f32[1,64], index: 2, kind: input, shape index: {}]   ;;  %s6262_s3 = inlined_call_operand.vmem [shape: bf16[64,64], index: 3, kind: input, shape index: {}]   ;;  %s6263_s4 = inlined_call_operand.vmem [shape: f32[1,64], index: 4, kind: input, shape index: {}]   ;;  %s6264_s5 = inlined_call_operand.vmem [shape: bf16[64,64], index: 5, kind: input, shape index: {}]   ;;  %s6265_s6 = inlined_call_operand.vmem [shape: f32[1,64], index: 6, kind: input, shape index: {}]   ;;  %s6266_s7 = inlined_call_operand.vmem [shape: bf16[64,128], index: 7, kind: input, shape index: {}]   ;;  %s6267_s8 = inlined_call_operand.vmem [shape: f32[1,128], index: 8, kind: input, shape index: {}]   ;;  %s6268_s9 = inlined_call_operand.hbm [shape: f32[32,128], index: 9, kind: output, shape index: {}]  }
   0x1   :  { %16 = vsyncpa [#allocation4 + $0x1], 0  ;;  %s5137_s30 = smov 0   ;;  %s5139_s10 = smov 0  }
   0x2   :  { %s5141_s11 = smov 0   ;;  %s5143_s12 = smov 0  }
   0x3 LB: > { %s3569_s13 = sadd.s32 4294967295, %s5079_s12   ;;  %s3570_s14 = sadd.s32 4294967294, %s5079_s12   ;;  %s5079_s12 = sphi %s5143_s12, %s6274_s12   ;;  %s5075_s11 = sphi %s5141_s11, %s6273_s11   ;;  %s5071_s10 = sphi %s5139_s10, %s6272_s10   ;;  %s5067_s30 = sphi %s5137_s30, %s6271_s30  }
   0x4   : > { %s5160_s15 = sadd.s32 1, %s5079_s12   ;;  %s29_s16 = sadd.s32 1, %s5075_s11 }
   0x5   : > { %s26_s17 = ssub.s32 %s5079_s12, %s5160_s15  ;;  %p36_p0 = scmp.ne.s32.totalorder %s5075_s11, %s5071_s10 }
   0x6   : > { %p27_p1 = scmp.eq.s32.totalorder %s26_s17, 0  ;;  %p37_p2 = scmp.eq.s32.totalorder %s5079_s12, 0 }
   0x7   : > { %p234_p3 = scmp.eq.s32.totalorder %s3569_s13, 1  ;;  %p239_p4 = scmp.ne.s32.totalorder %s5071_s10, %s5067_s30 }
   0x8   : > { %s5173_s18 = scalar_select %p27_p1, %s5075_s11, %s29_s16  }
   0x9   : > { %p38_p5 = por %p37_p2, %p36_p0  ;;  %p5175_p6 = por %p234_p3, %p36_p0 }
   0xa   : > { %p240_p7 = scmp.eq.s32.totalorder %s3570_s14, 1  ;;  %p3572_p9 = scmp.ge.s32.totalorder %s5079_s12, 2 }
   0xc   : > { %p5179_p8 = por %p240_p7, %p239_p4  ;;  %280 = sbr.rel (%p3572_p9) target bundleno = 36 (0x24), region = 48 }
  0x13   : > { %283 = sbr.rel (!%p38_p5) target bundleno = 36 (0x24), region = 52  ;;  %s285_s21 = sand.u32 (%p38_p5), 1, %s5075_s11  }
  0x14   : > { %s4034_s22 = sshll.u32 (%p38_p5), %s5079_s12, 3  ;;  %s4842_s23 = smul.u32 (%p38_p5), 200, %s285_s21 }
  0x15   : > { %s5191_s26 = scalar_lea.vmem (%p38_p5), %s6259_s0, %s4034_s22 }
  0x16   : > { %v306_v0 = vld [vmem:[%s5191_s26] sm:$0xff] (%p38_p5)   ;;  %v310_v1 = vld [vmem:[%s5191_s26 + $0x10] sm:$0xff] (%p38_p5)   ;;  %s5199_s27 = scalar_lea.vmem (%p38_p5), [#allocation2], %s4842_s23 }
  0x17   : > { %v314_v2 = vld [vmem:[%s5191_s26 + $0x20] sm:$0xff] (%p38_p5)   ;;  %v318_v3 = vld [vmem:[%s5191_s26 + $0x30] sm:$0xff] (%p38_p5)   ;;  %307 = vst [vmem:[%s5199_s27] sm:$0xff] (%p38_p5), %v306_v0   ;;  %311 = vst [vmem:[%s5199_s27 + $0x8] sm:$0xff] (%p38_p5), %v310_v1  }
  0x18   : > { %v322_v4 = vld [vmem:[%s5191_s26 + $0x40] sm:$0xff] (%p38_p5)   ;;  %v326_v5 = vld [vmem:[%s5191_s26 + $0x50] sm:$0xff] (%p38_p5)   ;;  %315 = vst [vmem:[%s5199_s27 + $0x10] sm:$0xff] (%p38_p5), %v314_v2   ;;  %319 = vst [vmem:[%s5199_s27 + $0x18] sm:$0xff] (%p38_p5), %v318_v3  }
  0x19   : > { %323 = vst [vmem:[%s5199_s27 + $0x20] sm:$0xff] (%p38_p5), %v322_v4   ;;  %327 = vst [vmem:[%s5199_s27 + $0x28] sm:$0xff] (%p38_p5), %v326_v5   ;;  %v330_v6 = vld [vmem:[%s5191_s26 + $0x60] sm:$0xff] (%p38_p5)   ;;  %v334_v7 = vld [vmem:[%s5191_s26 + $0x70] sm:$0xff] (%p38_p5)  }
  0x1a   : > { %v338_v8 = vld [vmem:[%s5191_s26 + $0x80] sm:$0xff]   ;;  %331 = vst [vmem:[%s5199_s27 + $0x30] sm:$0xff] %v330_v6   ;;  %335 = vst [vmem:[%s5199_s27 + $0x38] sm:$0xff] %v334_v7   ;;  %v342_v9 = vld [vmem:[%s5191_s26 + $0x90] sm:$0xff]  }
  0x1b   : > { %339 = vst [vmem:[%s5199_s27 + $0x40] sm:$0xff] %v338_v8   ;;  %v346_v10 = vld [vmem:[%s5191_s26 + $0xa0] sm:$0xff]   ;;  %v350_v11 = vld [vmem:[%s5191_s26 + $0xb0] sm:$0xff]   ;;  %343 = vst [vmem:[%s5199_s27 + $0x48] sm:$0xff] %v342_v9  }
  0x1c   : > { %347 = vst [vmem:[%s5199_s27 + $0x50] sm:$0xff] %v346_v10   ;;  %351 = vst [vmem:[%s5199_s27 + $0x58] sm:$0xff] %v350_v11   ;;  %v354_v12 = vld [vmem:[%s5191_s26 + $0xc0] sm:$0xff]   ;;  %v358_v13 = vld [vmem:[%s5191_s26 + $0xd0] sm:$0xff]  }
  0x1d   : > { %v362_v14 = vld [vmem:[%s5191_s26 + $0xe0] sm:$0xff]   ;;  %355 = vst [vmem:[%s5199_s27 + $0x60] sm:$0xff] %v354_v12   ;;  %359 = vst [vmem:[%s5199_s27 + $0x68] sm:$0xff] %v358_v13   ;;  %v366_v15 = vld [vmem:[%s5191_s26 + $0xf0] sm:$0xff]  }
  0x1e   : > { %363 = vst [vmem:[%s5199_s27 + $0x70] sm:$0xff] %v362_v14   ;;  %v370_v16 = vld [vmem:[%s5191_s26 + $0x100] sm:$0xff]   ;;  %v374_v17 = vld [vmem:[%s5191_s26 + $0x110] sm:$0xff]   ;;  %367 = vst [vmem:[%s5199_s27 + $0x78] sm:$0xff] %v366_v15  }
  0x1f   : > { %371 = vst [vmem:[%s5199_s27 + $0x80] sm:$0xff] %v370_v16   ;;  %375 = vst [vmem:[%s5199_s27 + $0x88] sm:$0xff] %v374_v17   ;;  %v378_v18 = vld [vmem:[%s5191_s26 + $0x120] sm:$0xff]   ;;  %v382_v19 = vld [vmem:[%s5191_s26 + $0x130] sm:$0xff]  }
  0x20   : > { %v386_v20 = vld [vmem:[%s5191_s26 + $0x140] sm:$0xff]   ;;  %379 = vst [vmem:[%s5199_s27 + $0x90] sm:$0xff] %v378_v18   ;;  %383 = vst [vmem:[%s5199_s27 + $0x98] sm:$0xff] %v382_v19   ;;  %v390_v21 = vld [vmem:[%s5191_s26 + $0x150] sm:$0xff]  }
  0x21   : > { %387 = vst [vmem:[%s5199_s27 + $0xa0] sm:$0xff] %v386_v20   ;;  %v394_v22 = vld [vmem:[%s5191_s26 + $0x160] sm:$0xff]   ;;  %v398_v23 = vld [vmem:[%s5191_s26 + $0x170] sm:$0xff]   ;;  %391 = vst [vmem:[%s5199_s27 + $0xa8] sm:$0xff] %v390_v21  }
  0x22   : > { %395 = vst [vmem:[%s5199_s27 + $0xb0] sm:$0xff] %v394_v22   ;;  %399 = vst [vmem:[%s5199_s27 + $0xb8] sm:$0xff] %v398_v23   ;;  %v402_v24 = vld [vmem:[%s5191_s26 + $0x180] sm:$0xff]  }
  0x23   : > { %403 = vst [vmem:[%s5199_s27 + $0xc0] sm:$0xff] %v402_v24  }
  0x24 PF: > { %p3575_p10 = scmp.ge.s32.totalorder %s5079_s12, 1  ;;  %p527_p11 = scmp.lt.s32.totalorder %s5079_s12, 3 }
  0x26   : > { %p528_p12 = pnand %p3575_p10, %p527_p11 }
  0x27   : > { %v573_v25 = vld [vmem:[%s6260_s1 + $0x2] sm:$0x3] (!%p528_p12)  ;;  %vm739_vm0 = vcmask (!%p528_p12), 1040384   ;;  %vm740_vm1 = vcmask (!%p528_p12), 1041408   ;;  %v5081_v26 = vmov (!%p528_p12), 0.0   ;;  %v5082_v27 = vmov (!%p528_p12), 65535  }
  0x28   : > { %531 = sbr.rel (%p528_p12) target bundleno = 1735 (0x6c7), region = 93  ;;  %4249 = vmatprep.subr.bf16.mxu0 (!%p528_p12), %v5081_v26  ;;  %4840 = vmatprep.subr.bf16.mxu1 (!%p528_p12), %v5081_v26  ;;  %v741_v28 = vsel (!%p528_p12), %vm739_vm0, 4294967295, %v5082_v27  ;;  %s5253_s14 = sand.u32 (!%p528_p12), 1, %s5071_s10   ;;  %vm5083_vm2 = vmmov (!%p528_p12), 0   ;;  %v574_v30 = vld [vmem:[%s6260_s1 + $0x4] sm:$0x3] (!%p528_p12) }
  0x29   : > { %v5255_v29 = vsel (!%p528_p12), %vm740_vm1, %v741_v28, 0  ;;  %4251 = vmatprep.mubr.msk.bf16.mxu0 (!%p528_p12), %vm5083_vm2, %v5081_v26  ;;  %4287 = vmatprep.mubr.msk.bf16.mxu1 (!%p528_p12), %vm5083_vm2, %v5081_v26  ;;  %s4843_s16 = smul.u32 (!%p528_p12), 200, %s5253_s14  ;;  %v572_v32 = vld [vmem:[%s6260_s1] sm:$0x3] (!%p528_p12)  ;;  %vm699_vm3 = vcmask (!%p528_p12), 23552   ;;  %vm3178_vm4 = vcmask (!%p528_p12), 523264  }
  0x2a   : > { %v744_v31 = vand.u32 (!%p528_p12), %v5255_v29, %v573_v25  ;;  %v1243_v34 = vand.u32 (!%p528_p12), %v5255_v29, %v574_v30  ;;  %v980_v36 = vand.u32 (!%p528_p12), %v5255_v29, %v572_v32  ;;  %v575_v43 = vld [vmem:[%s6260_s1 + $0x6] sm:$0x3] (!%p528_p12)  ;;  %v576_v55 = vld [vmem:[%s6260_s1 + $0x8] sm:$0x3] (!%p528_p12)  ;;  %v577_v9 = vld [vmem:[%s6260_s1 + $0xa] sm:$0x3] (!%p528_p12) }
  0x2b   : > { %s5269_s24 = scalar_lea.vmem (!%p528_p12), [#allocation2], %s4843_s16  ;;  %v1524_v46 = vand.u32 (!%p528_p12), %v5255_v29, %v575_v43  ;;  %v1805_v58 = vand.u32 (!%p528_p12), %v5255_v29, %v576_v55  ;;  %v2086_v12 = vand.u32 (!%p528_p12), %v5255_v29, %v577_v9  ;;  %v578_v21 = vld [vmem:[%s6260_s1 + $0xc] sm:$0x3] (!%p528_p12)  ;;  %s3576_s26 = sshll.u32 (!%p528_p12), %s5253_s14, 4 }
  0x2c   : > { %4250 = vmatpush3.bf16.msra.mxu0 (!%p528_p12), %v744_v31  ;;  %4841 = vmatpush3.bf16.msra.mxu1 (!%p528_p12), %v744_v31  ;;  %v4888_v33 = vld [vmem:[%s5269_s24 + $0x8] sm:$0xff] (!%p528_p12)   ;;  %v4889_v35 = vld [vmem:[%s5269_s24 + $0x50] sm:$0xff] (!%p528_p12)   ;;  %v4891_v38 = vld [vmem:[%s5269_s24 + $0x58] sm:$0xff] (!%p528_p12)   ;;  %v2367_v24 = vand.u32 (!%p528_p12), %v5255_v29, %v578_v21  ;;  %s4035_s27 = sshll.u32 (!%p528_p12), %s3569_s13, 8  ;;  %s568_s28 = scalar_lea.vmem (!%p528_p12), [#allocation3], %s3576_s26 }
  0x2d   : > { %4357 = vmatprep.subr.bf16.mxu0 (!%p528_p12), %v5081_v26  ;;  %4303 = vmatprep.subr.bf16.mxu1 (!%p528_p12), %v5081_v26  ;;  %v4890_v37 = vld [vmem:[%s5269_s24 + $0x10] sm:$0xff] (!%p528_p12)   ;;  %v4892_v39 = vld [vmem:[%s5269_s24 + $0x18] sm:$0xff] (!%p528_p12)   ;;  %v4893_v40 = vld [vmem:[%s5269_s24 + $0x60] sm:$0xff] (!%p528_p12)   ;;  %s6213_s17 = scalar_lea.hbm (!%p528_p12), %s6268_s9, %s4035_s27  ;;  %s3489_s13 = scalar_lea.sflag (!%p528_p12), [#allocation4], %s5253_s14 }
  0x2e   : > { %v4894_v41 = vld [vmem:[%s5269_s24 + $0x20] sm:$0xff] (!%p528_p12)   ;;  %v4895_v42 = vld [vmem:[%s5269_s24 + $0x68] sm:$0xff] (!%p528_p12)   ;;  %v4898_v47 = vld [vmem:[%s5269_s24 + $0x30] sm:$0xff] (!%p528_p12)   ;;  %s5084_s22 = smov (!%p528_p12), [#allocation3]  }
  0x2f   : > { %4252 = vmatmul.mubr.msk.bf16.vlgmr.msra.gmra.mrb[0].mxu0 %vm699_vm3, %v4888_v33  ;;  %4288 = vmatmul.mubr.msk.bf16.vlgmr.msra.gmra.mrb[0].mxu1 %vm699_vm3, %v4889_v35  ;;  %v4896_v44 = vld [vmem:[%s5269_s24 + $0x28] sm:$0xff]   ;;  %v4897_v45 = vld [vmem:[%s5269_s24] sm:$0xff]   ;;  %v4900_v49 = vld [vmem:[%s5269_s24 + $0x38] sm:$0xff]   ;;  %s5021_s23 = sshll.u32 %s5084_s22, 4  ;;  %s5022_s23 = int_to_ptr.vmem [resolvable:$false] %s5021_s23 }
  0x30   : > { %4358 = vmatpush3.bf16.msra.mxu0 %v1243_v34  ;;  %4255 = vmatprep.mubr.msk.bf16.mxu0 %vm5083_vm2, %v5081_v26  ;;  %v4899_v48 = vld [vmem:[%s5269_s24 + $0x8] sm:$0xff]   ;;  %v4901_v50 = vld [vmem:[%s5269_s24 + $0x10] sm:$0xff]   ;;  %v4902_v51 = vld [vmem:[%s5269_s24 + $0x40] sm:$0xff]   ;;  %s5023_s25 = scalar_lea.vmem %s5022_s23, 512 }
  0x31   : > { %4291 = vmatprep.mubr.msk.bf16.mxu1 %vm5083_vm2, %v5081_v26  ;;  %4304 = vmatpush3.bf16.msra.mxu1 %v980_v36  ;;  %v4903_v52 = vld [vmem:[%s5269_s24 + $0x18] sm:$0xff]   ;;  %v4904_v53 = vld [vmem:[%s5269_s24 + $0x48] sm:$0xff]   ;;  %v4905_v54 = vld [vmem:[%s5269_s24 + $0x20] sm:$0xff]  }
  0x32   : > { %4411 = vmatprep.subr.bf16.mxu1 %v5081_v26  ;;  %4465 = vmatprep.subr.bf16.mxu0 %v5081_v26  ;;  %v4906_v56 = vld [vmem:[%s5269_s24 + $0x28] sm:$0xff]   ;;  %v4907_v57 = vld [vmem:[%s5269_s24 + $0x10] sm:$0xff]   ;;  %v4909_v60 = vld [vmem:[%s5269_s24 + $0x18] sm:$0xff]  }
  0x33   : > { %v4908_v59 = vld [vmem:[%s5269_s24 + $0x30] sm:$0xff]   ;;  %v4910_v61 = vld [vmem:[%s5269_s24 + $0x38] sm:$0xff]   ;;  %v4911_v62 = vld [vmem:[%s5269_s24 + $0x20] sm:$0xff]  }
  0x34   : > { %v4912_v63 = vld [vmem:[%s5269_s24 + $0x40] sm:$0xff]   ;;  %v4913_v0 = vld [vmem:[%s5269_s24 + $0x28] sm:$0xff]   ;;  %v4915_v2 = vld [vmem:[%s5269_s24 + $0x30] sm:$0xff]  }
  0x35   : > { %v4914_v1 = vld [vmem:[%s5269_s24 + $0x48] sm:$0xff]   ;;  %v4916_v3 = vld [vmem:[%s5269_s24 + $0x50] sm:$0xff]   ;;  %v4917_v4 = vld [vmem:[%s5269_s24 + $0x38] sm:$0xff]  }
  0x36   : > { %v4918_v5 = vld [vmem:[%s5269_s24 + $0x58] sm:$0xff]   ;;  %v4919_v6 = vld [vmem:[%s5269_s24 + $0x40] sm:$0xff]   ;;  %v4921_v8 = vld [vmem:[%s5269_s24 + $0x48] sm:$0xff]  }
  0x37   : > { %4256 = vmatmul.mubr.msk.bf16.gmra.mrb[4].mxu0 %vm699_vm3, %v4890_v37  ;;  %4292 = vmatmul.mubr.msk.bf16.gmra.mrb[4].mxu1 %vm699_vm3, %v4891_v38  ;;  %v4920_v7 = vld [vmem:[%s5269_s24 + $0x60] sm:$0xff]   ;;  %v4922_v10 = vld [vmem:[%s5269_s24 + $0x50] sm:$0xff]   ;;  %v4923_v11 = vld [vmem:[%s5269_s24 + $0x28] sm:$0xff]  }
  0x38   : > { %4259 = vmatprep.mubr.msk.bf16.mxu0 %vm5083_vm2, %v5081_v26  ;;  %4295 = vmatprep.mubr.msk.bf16.mxu1 %vm5083_vm2, %v5081_v26  ;;  %v4924_v13 = vld [vmem:[%s5269_s24 + $0x58] sm:$0xff]   ;;  %v4925_v14 = vld [vmem:[%s5269_s24 + $0x30] sm:$0xff]   ;;  %v4926_v15 = vld [vmem:[%s5269_s24 + $0x60] sm:$0xff]  }
  0x39   : > { %v4927_v16 = vld [vmem:[%s5269_s24 + $0x38] sm:$0xff]   ;;  %v4928_v17 = vld [vmem:[%s5269_s24 + $0x68] sm:$0xff]   ;;  %v4929_v18 = vld [vmem:[%s5269_s24 + $0x40] sm:$0xff]  }
  0x3a   : > { %v4930_v19 = vld [vmem:[%s5269_s24 + $0x70] sm:$0xff]   ;;  %v4931_v20 = vld [vmem:[%s5269_s24 + $0x48] sm:$0xff]   ;;  %v4934_v25 = vld [vmem:[%s5269_s24 + $0x58] sm:$0xff]  }
  0x3b   : > { %v4932_v22 = vld [vmem:[%s5269_s24 + $0x50] sm:$0xff]   ;;  %v4935_v27 = vld [vmem:[%s5269_s24 + $0x38] sm:$0xff]   ;;  %v4936_v28 = vld [vmem:[%s5269_s24 + $0x60] sm:$0xff]  }
  0x3c   : > { %v4933_v23 = vld [vmem:[%s5269_s24 + $0x30] sm:$0xff]   ;;  %v4937_v30 = vld [vmem:[%s5269_s24 + $0x40] sm:$0xff]   ;;  %v4938_v31 = vld [vmem:[%s5269_s24 + $0x68] sm:$0xff]  }
  0x3d   : > { %v4939_v32 = vld [vmem:[%s5269_s24 + $0x48] sm:$0xff]   ;;  %v4940_v33 = vld [vmem:[%s5269_s24 + $0x70] sm:$0xff]   ;;  %v4942_v38 = vld [vmem:[%s5269_s24 + $0x78] sm:$0xff]  }
  0x3e   : > { %v4941_v34 = vld [vmem:[%s5269_s24 + $0x50] sm:$0xff]  }
  0x3f   : > { %4260 = vmatmul.mubr.msk.bf16.gmra.mrb[8].mxu0 %vm699_vm3, %v4892_v39  ;;  %4296 = vmatmul.mubr.msk.bf16.gmra.mrb[8].mxu1 %vm699_vm3, %v4893_v40  ;;  %v4943_v39 = vld [vmem:[%s5269_s24 + $0x58] sm:$0xff]  }
  0x40   : > { %4263 = vmatprep.mubr.msk.bf16.mxu0 %vm5083_vm2, %v5081_v26  ;;  %4299 = vmatprep.mubr.msk.bf16.mxu1 %vm5083_vm2, %v5081_v26 }
  0x47   : > { %4264 = vmatmul.mubr.msk.bf16.gmra.mrb[12].mxu0 %vm699_vm3, %v4894_v41  ;;  %4300 = vmatmul.mubr.msk.bf16.gmra.mrb[12].mxu1 %vm699_vm3, %v4895_v42 }
  0x48   : > { %4267 = vmatprep.mubr.msk.bf16.mxu0 %vm5083_vm2, %v5081_v26  ;;  %4305 = vmatprep.mubr.msk.bf16.mxu1 %vm5083_vm2, %v5081_v26 }
  0x4f   : > { %4268 = vmatmul.mubr.msk.bf16.gmra.mrb[16].mxu0 %vm699_vm3, %v4896_v44  ;;  %4306 = vmatmul.mubr.msk.bf16.vlgmr.msra.gmra.mrb[16].mxu1 %vm699_vm3, %v4897_v45 }
  0x50   : > { %4271 = vmatprep.mubr.msk.bf16.mxu0 %vm5083_vm2, %v5081_v26  ;;  %4309 = vmatprep.mubr.msk.bf16.mxu1 %vm5083_vm2, %v5081_v26 }
  0x51   : > { %4412 = vmatpush3.bf16.msra.mxu1 %v1524_v46 }
  0x52   : > { %4519 = vmatprep.subr.bf16.mxu1 %v5081_v26 }
  0x57   : > { %4272 = vmatmul.mubr.msk.bf16.gmra.mrb[20].mxu0 %vm699_vm3, %v4898_v47  ;;  %4310 = vmatmul.mubr.msk.bf16.gmra.mrb[20].mxu1 %vm699_vm3, %v4899_v48  ;;  %v4944_v48 = vld [vmem:[%s5269_s24 + $0x80] sm:$0xff]  }
  0x58   : > { %4275 = vmatprep.mubr.msk.bf16.mxu0 %vm5083_vm2, %v5081_v26  ;;  %4313 = vmatprep.mubr.msk.bf16.mxu1 %vm5083_vm2, %v5081_v26 }
  0x5f   : > { %4276 = vmatmul.mubr.msk.bf16.gmra.mrb[24].mxu0 %vm699_vm3, %v4900_v49  ;;  %4314 = vmatmul.mubr.msk.bf16.gmra.mrb[24].mxu1 %vm699_vm3, %v4901_v50  ;;  %v4945_v49 = vld [vmem:[%s5269_s24 + $0x60] sm:$0xff]  }
  0x60   : > { %4279 = vmatprep.mubr.msk.bf16.mxu0 %vm5083_vm2, %v5081_v26  ;;  %4317 = vmatprep.mubr.msk.bf16.mxu1 %vm5083_vm2, %v5081_v26 }
  0x67   : > { %4280 = vmatmul.mubr.msk.bf16.gmra.mrb[28].mxu0 %vm699_vm3, %v4902_v51  ;;  %4318 = vmatmul.mubr.msk.bf16.gmra.mrb[28].mxu1 %vm699_vm3, %v4903_v52 }
  0x68   : > { %4283 = vmatprep.mubr.msk.bf16.mxu0 %vm5083_vm2, %v5081_v26  ;;  %4321 = vmatprep.mubr.msk.bf16.mxu1 %vm5083_vm2, %v5081_v26 }
  0x6f   : > { %4284 = vmatmul.mubr.msk.bf16.gmra.mrb[32].mxu0 %vm699_vm3, %v4904_v53  ;;  %4322 = vmatmul.mubr.msk.bf16.gmra.mrb[32].mxu1 %vm699_vm3, %v4905_v54 }
  0x70   : > { %4325 = vmatprep.mubr.msk.bf16.mxu1 %vm5083_vm2, %v5081_v26  ;;  %4359 = vmatprep.mubr.msk.bf16.mxu0 %vm5083_vm2, %v5081_v26 }
  0x77   : > { %4326 = vmatmul.mubr.msk.bf16.gmra.mrb[36].mxu1 %vm699_vm3, %v4906_v56  ;;  %4360 = vmatmul.mubr.msk.bf16.vlgmr.msra.gmra.mrb[36].mxu0 %vm699_vm3, %v4907_v57 }
  0x78   : > { %4466 = vmatpush3.bf16.msra.mxu0 %v1805_v58  ;;  %4329 = vmatprep.mubr.msk.bf16.mxu1 %vm5083_vm2, %v5081_v26  ;;  %v4946_v58 = vld [vmem:[%s5269_s24 + $0x88] sm:$0xff]  }
  0x79   : > { %4363 = vmatprep.mubr.msk.bf16.mxu0 %vm5083_vm2, %v5081_v26  ;;  %4573 = vmatprep.subr.bf16.mxu0 %v5081_v26 }
  0x7f   : > { %4330 = vmatmul.mubr.msk.bf16.gmra.mrb[40].mxu1 %vm699_vm3, %v4908_v59  ;;  %4364 = vmatmul.mubr.msk.bf16.gmra.mrb[40].mxu0 %vm699_vm3, %v4909_v60  ;;  %v4947_v59 = vld [vmem:[%s5269_s24 + $0x68] sm:$0xff]  }
  0x80   : > { %4333 = vmatprep.mubr.msk.bf16.mxu1 %vm5083_vm2, %v5081_v26  ;;  %4367 = vmatprep.mubr.msk.bf16.mxu0 %vm5083_vm2, %v5081_v26 }
  0x87   : > { %4334 = vmatmul.mubr.msk.bf16.gmra.mrb[44].mxu1 %vm699_vm3, %v4910_v61  ;;  %4368 = vmatmul.mubr.msk.bf16.gmra.mrb[44].mxu0 %vm699_vm3, %v4911_v62 }
  0x88   : > { %4337 = vmatprep.mubr.msk.bf16.mxu1 %vm5083_vm2, %v5081_v26  ;;  %4371 = vmatprep.mubr.msk.bf16.mxu0 %vm5083_vm2, %v5081_v26 }
  0x8f   : > { %4338 = vmatmul.mubr.msk.bf16.gmra.mrb[48].mxu1 %vm699_vm3, %v4912_v63  ;;  %4372 = vmatmul.mubr.msk.bf16.gmra.mrb[48].mxu0 %vm699_vm3, %v4913_v0 }
  0x90   : > { %4341 = vmatprep.mubr.msk.bf16.mxu1 %vm5083_vm2, %v5081_v26  ;;  %4375 = vmatprep.mubr.msk.bf16.mxu0 %vm5083_vm2, %v5081_v26 }
  0x97   : > { %4342 = vmatmul.mubr.msk.bf16.gmra.mrb[52].mxu1 %vm699_vm3, %v4914_v1  ;;  %4376 = vmatmul.mubr.msk.bf16.gmra.mrb[52].mxu0 %vm699_vm3, %v4915_v2 }
  0x98   : > { %4345 = vmatprep.mubr.msk.bf16.mxu1 %vm5083_vm2, %v5081_v26  ;;  %4379 = vmatprep.mubr.msk.bf16.mxu0 %vm5083_vm2, %v5081_v26 }
  0x9f   : > { %4346 = vmatmul.mubr.msk.bf16.gmra.mrb[56].mxu1 %vm699_vm3, %v4916_v3  ;;  %4380 = vmatmul.mubr.msk.bf16.gmra.mrb[56].mxu0 %vm699_vm3, %v4917_v4  ;;  %v579_v3 = vld [vmem:[%s6260_s1 + $0xe] sm:$0x3] }
  0xa0   : > { %4349 = vmatprep.mubr.msk.bf16.mxu1 %vm5083_vm2, %v5081_v26  ;;  %4383 = vmatprep.mubr.msk.bf16.mxu0 %vm5083_vm2, %v5081_v26 }
  0xa7   : > { %4350 = vmatmul.mubr.msk.bf16.gmra.mrb[60].mxu1 %vm699_vm3, %v4918_v5  ;;  %4384 = vmatmul.mubr.msk.bf16.gmra.mrb[60].mxu0 %vm699_vm3, %v4919_v6  ;;  %v4948_v6 = vld [vmem:[%s5269_s24 + $0x70] sm:$0xff]  }
  0xa8   : > { %4353 = vmatprep.mubr.msk.bf16.mxu1 %vm5083_vm2, %v5081_v26  ;;  %4387 = vmatprep.mubr.msk.bf16.mxu0 %vm5083_vm2, %v5081_v26 }
  0xaf   : > { %4354 = vmatmul.mubr.msk.bf16.gmra.mrb[64].mxu1 %vm699_vm3, %v4920_v7  ;;  %4388 = vmatmul.mubr.msk.bf16.gmra.mrb[64].mxu0 %vm699_vm3, %v4921_v8  ;;  %v4949_v7 = vld [vmem:[%s5269_s24 + $0x38] sm:$0xff]  }
  0xb0   : > { %4391 = vmatprep.mubr.msk.bf16.mxu0 %vm5083_vm2, %v5081_v26  ;;  %4413 = vmatprep.mubr.msk.bf16.mxu1 %vm5083_vm2, %v5081_v26 }
  0xb7   : > { %4392 = vmatmul.mubr.msk.bf16.gmra.mrb[68].mxu0 %vm699_vm3, %v4922_v10  ;;  %4414 = vmatmul.mubr.msk.bf16.vlgmr.msra.gmra.mrb[68].mxu1 %vm699_vm3, %v4923_v11 }
  0xb8   : > { %4395 = vmatprep.mubr.msk.bf16.mxu0 %vm5083_vm2, %v5081_v26  ;;  %4417 = vmatprep.mubr.msk.bf16.mxu1 %vm5083_vm2, %v5081_v26 }
  0xb9   : > { %4520 = vmatpush3.bf16.msra.mxu1 %v2086_v12  ;;  %v2648_v12 = vand.u32 %v5255_v29, %v579_v3 }
  0xba   : > { %4627 = vmatprep.subr.bf16.mxu1 %v5081_v26 }
  0xbf   : > { %4396 = vmatmul.mubr.msk.bf16.gmra.mrb[72].mxu0 %vm699_vm3, %v4924_v13  ;;  %4418 = vmatmul.mubr.msk.bf16.gmra.mrb[72].mxu1 %vm699_vm3, %v4925_v14 }
  0xc0   : > { %4399 = vmatprep.mubr.msk.bf16.mxu0 %vm5083_vm2, %v5081_v26  ;;  %4421 = vmatprep.mubr.msk.bf16.mxu1 %vm5083_vm2, %v5081_v26 }
  0xc7   : > { %4400 = vmatmul.mubr.msk.bf16.gmra.mrb[76].mxu0 %vm699_vm3, %v4926_v15  ;;  %4422 = vmatmul.mubr.msk.bf16.gmra.mrb[76].mxu1 %vm699_vm3, %v4927_v16 }
  0xc8   : > { %4403 = vmatprep.mubr.msk.bf16.mxu0 %vm5083_vm2, %v5081_v26  ;;  %4425 = vmatprep.mubr.msk.bf16.mxu1 %vm5083_vm2, %v5081_v26 }
  0xcf   : > { %4404 = vmatmul.mubr.msk.bf16.gmra.mrb[80].mxu0 %vm699_vm3, %v4928_v17  ;;  %4426 = vmatmul.mubr.msk.bf16.gmra.mrb[80].mxu1 %vm699_vm3, %v4929_v18  ;;  %v4950_v18 = vld [vmem:[%s5269_s24 + $0x78] sm:$0xff]  }
  0xd0   : > { %4407 = vmatprep.mubr.msk.bf16.mxu0 %vm5083_vm2, %v5081_v26  ;;  %4429 = vmatprep.mubr.msk.bf16.mxu1 %vm5083_vm2, %v5081_v26 }
  0xd7   : > { %4408 = vmatmul.mubr.msk.bf16.gmra.mrb[84].mxu0 %vm699_vm3, %v4930_v19  ;;  %4430 = vmatmul.mubr.msk.bf16.gmra.mrb[84].mxu1 %vm699_vm3, %v4931_v20  ;;  %v4951_v19 = vld [vmem:[%s5269_s24 + $0x40] sm:$0xff]  }
  0xd8   : > { %4433 = vmatprep.mubr.msk.bf16.mxu1 %vm5083_vm2, %v5081_v26  ;;  %4467 = vmatprep.mubr.msk.bf16.mxu0 %vm5083_vm2, %v5081_v26 }
  0xdf   : > { %4434 = vmatmul.mubr.msk.bf16.gmra.mrb[88].mxu1 %vm699_vm3, %v4932_v22  ;;  %4468 = vmatmul.mubr.msk.bf16.vlgmr.msra.gmra.mrb[88].mxu0 %vm699_vm3, %v4933_v23 }
  0xe0   : > { %4574 = vmatpush3.bf16.msra.mxu0 %v2367_v24  ;;  %4437 = vmatprep.mubr.msk.bf16.mxu1 %vm5083_vm2, %v5081_v26 }
  0xe1   : > { %4471 = vmatprep.mubr.msk.bf16.mxu0 %vm5083_vm2, %v5081_v26  ;;  %4681 = vmatprep.subr.bf16.mxu0 %v5081_v26 }
  0xe7   : > { %4438 = vmatmul.mubr.msk.bf16.gmra.mrb[92].mxu1 %vm699_vm3, %v4934_v25  ;;  %4472 = vmatmul.mubr.msk.bf16.gmra.mrb[92].mxu0 %vm699_vm3, %v4935_v27 }
  0xe8   : > { %4441 = vmatprep.mubr.msk.bf16.mxu1 %vm5083_vm2, %v5081_v26  ;;  %4475 = vmatprep.mubr.msk.bf16.mxu0 %vm5083_vm2, %v5081_v26 }
  0xef   : > { %4442 = vmatmul.mubr.msk.bf16.gmra.mrb[96].mxu1 %vm699_vm3, %v4936_v28  ;;  %4476 = vmatmul.mubr.msk.bf16.gmra.mrb[96].mxu0 %vm699_vm3, %v4937_v30 }
  0xf0   : > { %4445 = vmatprep.mubr.msk.bf16.mxu1 %vm5083_vm2, %v5081_v26  ;;  %4479 = vmatprep.mubr.msk.bf16.mxu0 %vm5083_vm2, %v5081_v26 }
  0xf7   : > { %4446 = vmatmul.mubr.msk.bf16.gmra.mrb[100].mxu1 %vm699_vm3, %v4938_v31  ;;  %4480 = vmatmul.mubr.msk.bf16.gmra.mrb[100].mxu0 %vm699_vm3, %v4939_v32  ;;  %v4952_v32 = vld [vmem:[%s5269_s24 + $0x80] sm:$0xff]  }
  0xf8   : > { %4449 = vmatprep.mubr.msk.bf16.mxu1 %vm5083_vm2, %v5081_v26  ;;  %4483 = vmatprep.mubr.msk.bf16.mxu0 %vm5083_vm2, %v5081_v26 }
  0xff   : > { %4450 = vmatmul.mubr.msk.bf16.gmra.mrb[104].mxu1 %vm699_vm3, %v4940_v33  ;;  %4484 = vmatmul.mubr.msk.bf16.gmra.mrb[104].mxu0 %vm699_vm3, %v4941_v34  ;;  %v4953_v33 = vld [vmem:[%s5269_s24 + $0x48] sm:$0xff]  }
 0x100   : > { %4453 = vmatprep.mubr.msk.bf16.mxu1 %vm5083_vm2, %v5081_v26  ;;  %4487 = vmatprep.mubr.msk.bf16.mxu0 %vm5083_vm2, %v5081_v26 }
 0x102   : > { %v780_v35 = vpop.f32.mrb[0].mxu0  ;;  %v846_v36 = vpop.f32.mrb[0].mxu1 }
 0x103   : > { %v4253_v37 = vpop.f32.mrb[1].mxu0  ;;  %v4289_v40 = vpop.f32.mrb[1].mxu1 }
 0x104   : > { %v783_v41 = vpop.f32.mrb[2].mxu0  ;;  %v848_v42 = vpop.f32.mrb[2].mxu1 }
 0x105   : > { %v4254_v43 = vpop.f32.mrb[3].mxu0  ;;  %v4290_v44 = vpop.f32.mrb[3].mxu1 }
 0x106   : > { %v4954_v44 = vld [vmem:[%s5269_s24 + $0x88] sm:$0xff]  }
 0x107   : > { %4454 = vmatmul.mubr.msk.bf16.gmra.mrb[108].mxu1 %vm699_vm3, %v4942_v38  ;;  %4488 = vmatmul.mubr.msk.bf16.gmra.mrb[108].mxu0 %vm699_vm3, %v4943_v39 }
 0x108   : > { %4457 = vmatprep.mubr.msk.bf16.mxu1 %vm5083_vm2, %v5081_v26  ;;  %4491 = vmatprep.mubr.msk.bf16.mxu0 %vm5083_vm2, %v5081_v26 }
 0x10a   : > { %v5521_v45 = vpop.f32.mrb[4].mxu0  ;;  %v5523_v46 = vpop.f32.mrb[4].mxu1 }
 0x10b   : > { %v4257_v47 = vpop.f32.mrb[5].mxu0  ;;  %v4293_v50 = vpop.f32.mrb[5].mxu1 }
 0x10c   : > { %v5527_v51 = vpop.f32.mrb[6].mxu0  ;;  %v5529_v52 = vpop.f32.mrb[6].mxu1 }
 0x10d   : > { %v4258_v53 = vpop.f32.mrb[7].mxu0  ;;  %v4294_v54 = vpop.f32.mrb[7].mxu1 }
 0x10f   : > { %4458 = vmatmul.mubr.msk.bf16.gmra.mrb[112].mxu1 %vm699_vm3, %v4944_v48  ;;  %4492 = vmatmul.mubr.msk.bf16.gmra.mrb[112].mxu0 %vm699_vm3, %v4945_v49 }
 0x110   : > { %4461 = vmatprep.mubr.msk.bf16.mxu1 %vm5083_vm2, %v5081_v26  ;;  %4495 = vmatprep.mubr.msk.bf16.mxu0 %vm5083_vm2, %v5081_v26 }
 0x112   : > { %v5537_v55 = vpop.f32.mrb[8].mxu0  ;;  %v5539_v56 = vpop.f32.mrb[8].mxu1 }
 0x113   : > { %v4261_v57 = vpop.f32.mrb[9].mxu0  ;;  %v4297_v60 = vpop.f32.mrb[9].mxu1 }
 0x114   : > { %v5543_v61 = vpop.f32.mrb[10].mxu0  ;;  %v5545_v62 = vpop.f32.mrb[10].mxu1  ;;  %v4956_v57 = vld [vmem:[%s5269_s24 + $0x90] sm:$0xff]  }
 0x115   : > { %v4262_v63 = vpop.f32.mrb[11].mxu0  ;;  %v4298_v0 = vpop.f32.mrb[11].mxu1 }
 0x117   : > { %4462 = vmatmul.mubr.msk.bf16.gmra.mrb[116].mxu1 %vm699_vm3, %v4946_v58  ;;  %4496 = vmatmul.mubr.msk.bf16.gmra.mrb[116].mxu0 %vm699_vm3, %v4947_v59  ;;  %v4957_v58 = vld [vmem:[%s5269_s24 + $0x58] sm:$0xff]  }
 0x118   : > { %4499 = vmatprep.mubr.msk.bf16.mxu0 %vm5083_vm2, %v5081_v26  ;;  %4521 = vmatprep.mubr.msk.bf16.mxu1 %vm5083_vm2, %v5081_v26 }
 0x11a   : > { %v804_v1 = vpop.f32.mrb[12].mxu0  ;;  %v5553_v2 = vpop.f32.mrb[12].mxu1 }
 0x11b   : > { %v4265_v4 = vpop.f32.mrb[13].mxu0  ;;  %v4301_v5 = vpop.f32.mrb[13].mxu1  ;;  %v580_v1 = vld [vmem:[%s6260_s1 + $0x10] sm:$0x3] }
 0x11c   : > { %v806_v8 = vpop.f32.mrb[14].mxu0  ;;  %v5560_v9 = vpop.f32.mrb[14].mxu1 }
 0x11d   : > { %v4266_v10 = vpop.f32.mrb[15].mxu0  ;;  %v4302_v11 = vpop.f32.mrb[15].mxu1  ;;  %v4959_v8 = vld [vmem:[%s5269_s24 + $0x50] sm:$0xff]  }
 0x11f   : > { %4500 = vmatmul.mubr.msk.bf16.gmra.mrb[120].mxu0 %vm699_vm3, %v4948_v6  ;;  %4522 = vmatmul.mubr.msk.bf16.vlgmr.msra.gmra.mrb[120].mxu1 %vm699_vm3, %v4949_v7  ;;  %v4958_v7 = vld [vmem:[%s5269_s24 + $0x60] sm:$0xff]  }
 0x120   : > { %4503 = vmatprep.mubr.msk.bf16.mxu0 %vm5083_vm2, %v5081_v26  ;;  %4525 = vmatprep.mubr.msk.bf16.mxu1 %vm5083_vm2, %v5081_v26 }
 0x121   : > { %4628 = vmatpush3.bf16.msra.mxu1 %v2648_v12  ;;  %v2929_v12 = vand.u32 %v5255_v29, %v580_v1 }
 0x122   : > { %v810_v13 = vpop.f32.mrb[16].mxu0  ;;  %v1016_v14 = vpop.f32.mrb[16].mxu1 }
 0x123   : > { %v5569_v15 = vadd.f32 %v1016_v14, %v780_v35  ;;  %v4269_v16 = vpop.f32.mrb[17].mxu0  ;;  %v4307_v17 = vpop.f32.mrb[17].mxu1 }
 0x124   : > { %v812_v20 = vpop.f32.mrb[18].mxu0  ;;  %v1019_v21 = vpop.f32.mrb[18].mxu1 }
 0x125   : > { %v5573_v22 = vadd.f32 %v1019_v21, %v783_v41  ;;  %v4270_v23 = vpop.f32.mrb[19].mxu0  ;;  %v4308_v24 = vpop.f32.mrb[19].mxu1  ;;  %v4960_v21 = vld [vmem:[%s5269_s24 + $0x68] sm:$0xff]  }
 0x126   : > { %v4961_v23 = vld [vmem:[%s5269_s24 + $0x58] sm:$0xff]  }
 0x127   : > { %4504 = vmatmul.mubr.msk.bf16.gmra.mrb[124].mxu0 %vm699_vm3, %v4950_v18  ;;  %4526 = vmatmul.mubr.msk.bf16.gmra.mrb[124].mxu1 %vm699_vm3, %v4951_v19 }
 0x128   : > { %4507 = vmatprep.mubr.msk.bf16.mxu0 %vm5083_vm2, %v5081_v26  ;;  %4529 = vmatprep.mubr.msk.bf16.mxu1 %vm5083_vm2, %v5081_v26 }
 0x12a   : > { %v5581_v25 = vpop.f32.mrb[20].mxu0  ;;  %v1024_v27 = vpop.f32.mrb[20].mxu1 }
 0x12b   : > { %v5584_v28 = vadd.f32 %v1024_v27, %v5521_v45  ;;  %v4273_v30 = vpop.f32.mrb[21].mxu0  ;;  %v4311_v31 = vpop.f32.mrb[21].mxu1  ;;  %v4955_v45 = vld [vmem:[%s5269_s24 + $0x50] sm:$0xff]  }
 0x12c   : > { %v5588_v34 = vpop.f32.mrb[22].mxu0  ;;  %v1027_v35 = vpop.f32.mrb[22].mxu1 }
 0x12d   : > { %v5591_v36 = vadd.f32 %v1027_v35, %v5527_v51  ;;  %v4274_v37 = vpop.f32.mrb[23].mxu0  ;;  %v4312_v38 = vpop.f32.mrb[23].mxu1 }
 0x12e   : > { %v4962_v38 = vld [vmem:[%s5269_s24 + $0x70] sm:$0xff]  }
 0x12f   : > { %4508 = vmatmul.mubr.msk.bf16.gmra.mrb[128].mxu0 %vm699_vm3, %v4952_v32  ;;  %4530 = vmatmul.mubr.msk.bf16.gmra.mrb[128].mxu1 %vm699_vm3, %v4953_v33 }
 0x130   : > { %4511 = vmatprep.mubr.msk.bf16.mxu0 %vm5083_vm2, %v5081_v26  ;;  %4533 = vmatprep.mubr.msk.bf16.mxu1 %vm5083_vm2, %v5081_v26 }
 0x132   : > { %v5599_v39 = vpop.f32.mrb[24].mxu0  ;;  %v1032_v40 = vpop.f32.mrb[24].mxu1 }
 0x133   : > { %v5602_v41 = vadd.f32 %v1032_v40, %v5537_v55  ;;  %v4277_v42 = vpop.f32.mrb[25].mxu0  ;;  %v4315_v43 = vpop.f32.mrb[25].mxu1  ;;  %v4963_v40 = vld [vmem:[%s5269_s24 + $0x60] sm:$0xff]  }
 0x134   : > { %v5606_v47 = vpop.f32.mrb[26].mxu0  ;;  %v1035_v48 = vpop.f32.mrb[26].mxu1 }
 0x135   : > { %v5609_v49 = vadd.f32 %v1035_v48, %v5543_v61  ;;  %v4278_v50 = vpop.f32.mrb[27].mxu0  ;;  %v4316_v51 = vpop.f32.mrb[27].mxu1 }
 0x137   : > { %4512 = vmatmul.mubr.msk.bf16.gmra.mrb[132].mxu0 %vm699_vm3, %v4954_v44  ;;  %4534 = vmatmul.mubr.msk.bf16.gmra.mrb[132].mxu1 %vm699_vm3, %v4955_v45 }
 0x138   : > { %4515 = vmatprep.mubr.msk.bf16.mxu0 %vm5083_vm2, %v5081_v26  ;;  %4537 = vmatprep.mubr.msk.bf16.mxu1 %vm5083_vm2, %v5081_v26 }
 0x13a   : > { %v5617_v53 = vpop.f32.mrb[28].mxu0  ;;  %v1040_v54 = vpop.f32.mrb[28].mxu1 }
 0x13b   : > { %v4281_v55 = vpop.f32.mrb[29].mxu0  ;;  %v4319_v59 = vpop.f32.mrb[29].mxu1 }
 0x13c   : > { %v5621_v60 = vpop.f32.mrb[30].mxu0  ;;  %v1042_v61 = vpop.f32.mrb[30].mxu1  ;;  %v4964_v55 = vld [vmem:[%s5269_s24 + $0x78] sm:$0xff]  }
 0x13d   : > { %v4282_v63 = vpop.f32.mrb[31].mxu0  ;;  %v4320_v0 = vpop.f32.mrb[31].mxu1 }
 0x13f   : > { %4516 = vmatmul.mubr.msk.bf16.gmra.mrb[136].mxu0 %vm699_vm3, %v4956_v57  ;;  %4538 = vmatmul.mubr.msk.bf16.gmra.mrb[136].mxu1 %vm699_vm3, %v4957_v58  ;;  %v4965_v57 = vld [vmem:[%s5269_s24 + $0x68] sm:$0xff]  }
 0x140   : > { %4541 = vmatprep.mubr.msk.bf16.mxu1 %vm5083_vm2, %v5081_v26  ;;  %4575 = vmatprep.mubr.msk.bf16.mxu0 %vm5083_vm2, %v5081_v26 }
 0x142   : > { %v840_v3 = vpop.f32.mrb[32].mxu0  ;;  %v1046_v4 = vpop.f32.mrb[32].mxu1 }
 0x143   : > { %v4285_v5 = vpop.f32.mrb[33].mxu0  ;;  %v4323_v6 = vpop.f32.mrb[33].mxu1 }
 0x144   : > { %v842_v10 = vpop.f32.mrb[34].mxu0  ;;  %v1048_v11 = vpop.f32.mrb[34].mxu1 }
 0x145   : > { %v4286_v13 = vpop.f32.mrb[35].mxu0  ;;  %v4324_v14 = vpop.f32.mrb[35].mxu1 }
 0x146   : > { %v4968_v14 = vld [vmem:[%s5269_s24 + $0x88] sm:$0xff]  }
 0x147   : > { %4542 = vmatmul.mubr.msk.bf16.gmra.mrb[140].mxu1 %vm699_vm3, %v4958_v7  ;;  %4576 = vmatmul.mubr.msk.bf16.vlgmr.msra.gmra.mrb[140].mxu0 %vm699_vm3, %v4959_v8 }
 0x148   : > { %4682 = vmatpush3.bf16.msra.mxu0 %v2929_v12  ;;  %4545 = vmatprep.mubr.msk.bf16.mxu1 %vm5083_vm2, %v5081_v26 }
 0x149   : > { %4579 = vmatprep.mubr.msk.bf16.mxu0 %vm5083_vm2, %v5081_v26 }
 0x14a   : > { %v1052_v16 = vpop.f32.mrb[36].mxu1  ;;  %v1279_v17 = vpop.f32.mrb[36].mxu0 }
 0x14b   : > { %v5642_v18 = vadd.f32 %v1052_v16, %v5581_v25  ;;  %v5645_v29 = vadd.f32 %v1279_v17, %v5569_v15  ;;  %v4327_v19 = vpop.f32.mrb[37].mxu1  ;;  %v4361_v20 = vpop.f32.mrb[37].mxu0  ;;  %v4969_v16 = vld [vmem:[%s5269_s24 + $0x78] sm:$0xff]  }
 0x14c   : > { %v1055_v24 = vpop.f32.mrb[38].mxu1  ;;  %v1282_v27 = vpop.f32.mrb[38].mxu0 }
 0x14d   : > { %v5650_v30 = vadd.f32 %v1055_v24, %v5588_v34  ;;  %v5653_v31 = vadd.f32 %v1282_v27, %v5573_v22  ;;  %v4362_v32 = vpop.f32.mrb[39].mxu0  ;;  %v4328_v25 = vpop.f32.mrb[39].mxu1 }
 0x14f   : > { %4546 = vmatmul.mubr.msk.bf16.gmra.mrb[144].mxu1 %vm699_vm3, %v4960_v21  ;;  %4580 = vmatmul.mubr.msk.bf16.gmra.mrb[144].mxu0 %vm699_vm3, %v4961_v23 }
 0x150   : > { %4549 = vmatprep.mubr.msk.bf16.mxu1 %vm5083_vm2, %v5081_v26  ;;  %4583 = vmatprep.mubr.msk.bf16.mxu0 %vm5083_vm2, %v5081_v26 }
 0x152   : > { %v1060_v15 = vpop.f32.mrb[40].mxu1  ;;  %v1287_v33 = vpop.f32.mrb[40].mxu0 }
 0x153   : > { %v5662_v34 = vadd.f32 %v1060_v15, %v5599_v39  ;;  %v5665_v22 = vadd.f32 %v1287_v33, %v5584_v28  ;;  %v4331_v35 = vpop.f32.mrb[41].mxu1  ;;  %v4365_v37 = vpop.f32.mrb[41].mxu0  ;;  %v4970_v33 = vld [vmem:[%s5269_s24 + $0x90] sm:$0xff]  }
 0x154   : > { %v1063_v42 = vpop.f32.mrb[42].mxu1  ;;  %v1290_v43 = vpop.f32.mrb[42].mxu0  ;;  %v4971_v35 = vld [vmem:[%s5269_s24 + $0x80] sm:$0xff]  }
 0x155   : > { %v5670_v44 = vadd.f32 %v1063_v42, %v5606_v47  ;;  %v5673_v45 = vadd.f32 %v1290_v43, %v5591_v36  ;;  %v4366_v48 = vpop.f32.mrb[43].mxu0  ;;  %v4332_v39 = vpop.f32.mrb[43].mxu1 }
 0x157   : > { %4550 = vmatmul.mubr.msk.bf16.gmra.mrb[148].mxu1 %vm699_vm3, %v4962_v38  ;;  %4584 = vmatmul.mubr.msk.bf16.gmra.mrb[148].mxu0 %vm699_vm3, %v4963_v40 }
 0x158   : > { %4553 = vmatprep.mubr.msk.bf16.mxu1 %vm5083_vm2, %v5081_v26  ;;  %4587 = vmatprep.mubr.msk.bf16.mxu0 %vm5083_vm2, %v5081_v26 }
 0x15a   : > { %v1068_v28 = vpop.f32.mrb[44].mxu1  ;;  %v1295_v50 = vpop.f32.mrb[44].mxu0 }
 0x15b   : > { %v5682_v47 = vadd.f32 %v1068_v28, %v5617_v53  ;;  %v5685_v36 = vadd.f32 %v1295_v50, %v5602_v41  ;;  %v4335_v51 = vpop.f32.mrb[45].mxu1  ;;  %v4369_v54 = vpop.f32.mrb[45].mxu0  ;;  %v4972_v50 = vld [vmem:[%s5269_s24 + $0x98] sm:$0xff]  }
 0x15c   : > { %v1071_v58 = vpop.f32.mrb[46].mxu1  ;;  %v1298_v59 = vpop.f32.mrb[46].mxu0  ;;  %v4973_v51 = vld [vmem:[%s5269_s24 + $0x88] sm:$0xff]  }
 0x15d   : > { %v5690_v61 = vadd.f32 %v1071_v58, %v5621_v60  ;;  %v5693_v63 = vadd.f32 %v1298_v59, %v5609_v49  ;;  %v4370_v0 = vpop.f32.mrb[47].mxu0  ;;  %v4336_v53 = vpop.f32.mrb[47].mxu1  ;;  %v4966_v60 = vld [vmem:[%s5269_s24 + $0x80] sm:$0xff]   ;;  %v4967_v49 = vld [vmem:[%s5269_s24 + $0x70] sm:$0xff]  }
 0x15f   : > { %4554 = vmatmul.mubr.msk.bf16.gmra.mrb[152].mxu1 %vm699_vm3, %v4964_v55  ;;  %4588 = vmatmul.mubr.msk.bf16.gmra.mrb[152].mxu0 %vm699_vm3, %v4965_v57 }
 0x160   : > { %4557 = vmatprep.mubr.msk.bf16.mxu1 %vm5083_vm2, %v5081_v26  ;;  %4591 = vmatprep.mubr.msk.bf16.mxu0 %vm5083_vm2, %v5081_v26 }
 0x162   : > { %v1303_v41 = vpop.f32.mrb[48].mxu0  ;;  %v1076_v1 = vpop.f32.mrb[48].mxu1 }
 0x163   : > { %v4373_v3 = vpop.f32.mrb[49].mxu0  ;;  %v4339_v4 = vpop.f32.mrb[49].mxu1  ;;  %v4974_v1 = vld [vmem:[%s5269_s24 + $0x90] sm:$0xff]  }
 0x164   : > { %v1305_v5 = vpop.f32.mrb[50].mxu0  ;;  %v1078_v6 = vpop.f32.mrb[50].mxu1  ;;  %v4975_v3 = vld [vmem:[%s5269_s24 + $0x58] sm:$0xff]  }
 0x165   : > { %v4374_v7 = vpop.f32.mrb[51].mxu0  ;;  %v4340_v8 = vpop.f32.mrb[51].mxu1 }
 0x167   : > { %4558 = vmatmul.mubr.msk.bf16.gmra.mrb[156].mxu1 %vm699_vm3, %v4966_v60  ;;  %4592 = vmatmul.mubr.msk.bf16.gmra.mrb[156].mxu0 %vm699_vm3, %v4967_v49 }
 0x168   : > { %4561 = vmatprep.mubr.msk.bf16.mxu1 %vm5083_vm2, %v5081_v26  ;;  %4595 = vmatprep.mubr.msk.bf16.mxu0 %vm5083_vm2, %v5081_v26 }
 0x16a   : > { %v1309_v10 = vpop.f32.mrb[52].mxu0  ;;  %v1082_v11 = vpop.f32.mrb[52].mxu1 }
 0x16b   : > { %v4377_v12 = vpop.f32.mrb[53].mxu0  ;;  %v4343_v13 = vpop.f32.mrb[53].mxu1  ;;  %v4976_v10 = vld [vmem:[%s5269_s24 + $0x98] sm:$0xff]   ;;  %v4977_v11 = vld [vmem:[%s5269_s24 + $0x60] sm:$0xff]  }
 0x16c   : > { %v1311_v17 = vpop.f32.mrb[54].mxu0  ;;  %v1084_v19 = vpop.f32.mrb[54].mxu1 }
 0x16d   : > { %v4378_v20 = vpop.f32.mrb[55].mxu0  ;;  %v4344_v21 = vpop.f32.mrb[55].mxu1 }
 0x16f   : > { %4562 = vmatmul.mubr.msk.bf16.gmra.mrb[160].mxu1 %vm699_vm3, %v4968_v14  ;;  %4596 = vmatmul.mubr.msk.bf16.gmra.mrb[160].mxu0 %vm699_vm3, %v4969_v16 }
 0x170   : > { %4565 = vmatprep.mubr.msk.bf16.mxu1 %vm5083_vm2, %v5081_v26  ;;  %4599 = vmatprep.mubr.msk.bf16.mxu0 %vm5083_vm2, %v5081_v26 }
 0x172   : > { %v1088_v23 = vpop.f32.mrb[56].mxu1  ;;  %v1315_v24 = vpop.f32.mrb[56].mxu0 }
 0x173   : > { %v5718_v27 = vadd.f32 %v1088_v23, %v5523_v46  ;;  %v5721_v32 = vadd.f32 %v1315_v24, %v5642_v18  ;;  %v4347_v25 = vpop.f32.mrb[57].mxu1  ;;  %v4381_v15 = vpop.f32.mrb[57].mxu0  ;;  %v4978_v23 = vld [vmem:[%s5269_s24 + $0xa0] sm:$0xff]   ;;  %v4979_v24 = vld [vmem:[%s5269_s24 + $0x68] sm:$0xff]  }
 0x174   : > { %v1091_v37 = vpop.f32.mrb[58].mxu1  ;;  %v1318_v38 = vpop.f32.mrb[58].mxu0 }
 0x175   : > { %v5726_v40 = vadd.f32 %v1091_v37, %v5529_v52  ;;  %v5729_v42 = vadd.f32 %v1318_v38, %v5650_v30  ;;  %v4382_v43 = vpop.f32.mrb[59].mxu0  ;;  %v4348_v46 = vpop.f32.mrb[59].mxu1 }
 0x177   : > { %4566 = vmatmul.mubr.msk.bf16.gmra.mrb[164].mxu1 %vm699_vm3, %v4970_v33  ;;  %4600 = vmatmul.mubr.msk.bf16.gmra.mrb[164].mxu0 %vm699_vm3, %v4971_v35 }
 0x178   : > { %4569 = vmatprep.mubr.msk.bf16.mxu1 %vm5083_vm2, %v5081_v26  ;;  %4603 = vmatprep.mubr.msk.bf16.mxu0 %vm5083_vm2, %v5081_v26 }
 0x17a   : > { %v1096_v18 = vpop.f32.mrb[60].mxu1  ;;  %v1323_v48 = vpop.f32.mrb[60].mxu0 }
 0x17b   : > { %v5738_v52 = vadd.f32 %v1096_v18, %v5539_v56  ;;  %v5741_v30 = vadd.f32 %v1323_v48, %v5662_v34  ;;  %v4351_v39 = vpop.f32.mrb[61].mxu1  ;;  %v4385_v28 = vpop.f32.mrb[61].mxu0  ;;  %v4980_v48 = vld [vmem:[%s5269_s24 + $0xa8] sm:$0xff]  }
 0x17c   : > { %v1099_v54 = vpop.f32.mrb[62].mxu1  ;;  %v1326_v55 = vpop.f32.mrb[62].mxu0  ;;  %v4981_v39 = vld [vmem:[%s5269_s24 + $0x70] sm:$0xff]  }
 0x17d   : > { %v5746_v57 = vadd.f32 %v1099_v54, %v5545_v62  ;;  %v5749_v58 = vadd.f32 %v1326_v55, %v5670_v44  ;;  %v4386_v59 = vpop.f32.mrb[63].mxu0  ;;  %v4352_v56 = vpop.f32.mrb[63].mxu1 }
 0x17f   : > { %4570 = vmatmul.mubr.msk.bf16.gmra.mrb[168].mxu1 %vm699_vm3, %v4972_v50  ;;  %4604 = vmatmul.mubr.msk.bf16.gmra.mrb[168].mxu0 %vm699_vm3, %v4973_v51 }
 0x180   : > { %4607 = vmatprep.mubr.msk.bf16.mxu0 %vm5083_vm2, %v5081_v26  ;;  %4629 = vmatprep.mubr.msk.bf16.mxu1 %vm5083_vm2, %v5081_v26 }
 0x182   : > { %v1104_v34 = vpop.f32.mrb[64].mxu1  ;;  %v1331_v0 = vpop.f32.mrb[64].mxu0 }
 0x183   : > { %v5758_v62 = vadd.f32 %v1104_v34, %v5553_v2  ;;  %v5761_v44 = vadd.f32 %v1331_v0, %v5682_v47  ;;  %v4355_v53 = vpop.f32.mrb[65].mxu1  ;;  %v4389_v41 = vpop.f32.mrb[65].mxu0  ;;  %v4983_v34 = vld [vmem:[%s5269_s24 + $0x78] sm:$0xff]  }
 0x184   : > { %v1107_v60 = vpop.f32.mrb[66].mxu1  ;;  %v1334_v49 = vpop.f32.mrb[66].mxu0 }
 0x185   : > { %v5766_v4 = vadd.f32 %v1107_v60, %v5560_v9  ;;  %v5769_v5 = vadd.f32 %v1334_v49, %v5690_v61  ;;  %v4390_v6 = vpop.f32.mrb[67].mxu0  ;;  %v4356_v2 = vpop.f32.mrb[67].mxu1 }
 0x187   : > { %4608 = vmatmul.mubr.msk.bf16.gmra.mrb[172].mxu0 %vm699_vm3, %v4974_v1  ;;  %4630 = vmatmul.mubr.msk.bf16.vlgmr.msra.gmra.mrb[172].mxu1 %vm699_vm3, %v4975_v3 }
 0x188   : > { %4611 = vmatprep.mubr.msk.bf16.mxu0 %vm5083_vm2, %v5081_v26  ;;  %4633 = vmatprep.mubr.msk.bf16.mxu1 %vm5083_vm2, %v5081_v26 }
 0x18a   : > { %v1339_v47 = vpop.f32.mrb[68].mxu0  ;;  %v1560_v7 = vpop.f32.mrb[68].mxu1 }
 0x18b   : > { %v5778_v9 = vadd.f32 %v1560_v7, %v5645_v29  ;;  %v4393_v8 = vpop.f32.mrb[69].mxu0  ;;  %v4415_v61 = vpop.f32.mrb[69].mxu1  ;;  %v4984_v47 = vld [vmem:[%s5269_s24 + $0x80] sm:$0xff]  }
 0x18c   : > { %v1341_v12 = vpop.f32.mrb[70].mxu0  ;;  %v1563_v13 = vpop.f32.mrb[70].mxu1  ;;  %v4985_v7 = vld [vmem:[%s5269_s24 + $0x60] sm:$0xff]  }
 0x18d   : > { %v5783_v14 = vadd.f32 %v1563_v13, %v5653_v31  ;;  %v4394_v16 = vpop.f32.mrb[71].mxu0  ;;  %v4416_v17 = vpop.f32.mrb[71].mxu1 }
 0x18f   : > { %4612 = vmatmul.mubr.msk.bf16.gmra.mrb[176].mxu0 %vm699_vm3, %v4976_v10  ;;  %4634 = vmatmul.mubr.msk.bf16.gmra.mrb[176].mxu1 %vm699_vm3, %v4977_v11 }
 0x190   : > { %4615 = vmatprep.mubr.msk.bf16.mxu0 %vm5083_vm2, %v5081_v26  ;;  %4637 = vmatprep.mubr.msk.bf16.mxu1 %vm5083_vm2, %v5081_v26 }
 0x192   : > { %v1345_v29 = vpop.f32.mrb[72].mxu0  ;;  %v1568_v19 = vpop.f32.mrb[72].mxu1 }
 0x193   : > { %v5792_v20 = vadd.f32 %v1568_v19, %v5665_v22  ;;  %v4397_v21 = vpop.f32.mrb[73].mxu0  ;;  %v4419_v31 = vpop.f32.mrb[73].mxu1  ;;  %v4986_v19 = vld [vmem:[%s5269_s24 + $0x88] sm:$0xff]  }
 0x194   : > { %v1347_v25 = vpop.f32.mrb[74].mxu0  ;;  %v1571_v15 = vpop.f32.mrb[74].mxu1  ;;  %v4987_v21 = vld [vmem:[%s5269_s24 + $0x68] sm:$0xff]  }
 0x195   : > { %v5797_v33 = vadd.f32 %v1571_v15, %v5673_v45  ;;  %v4398_v35 = vpop.f32.mrb[75].mxu0  ;;  %v4420_v37 = vpop.f32.mrb[75].mxu1 }
 0x197   : > { %4616 = vmatmul.mubr.msk.bf16.gmra.mrb[180].mxu0 %vm699_vm3, %v4978_v23  ;;  %4638 = vmatmul.mubr.msk.bf16.gmra.mrb[180].mxu1 %vm699_vm3, %v4979_v24 }
 0x198   : > { %4619 = vmatprep.mubr.msk.bf16.mxu0 %vm5083_vm2, %v5081_v26  ;;  %4641 = vmatprep.mubr.msk.bf16.mxu1 %vm5083_vm2, %v5081_v26 }
 0x19a   : > { %v1351_v22 = vpop.f32.mrb[76].mxu0  ;;  %v1576_v38 = vpop.f32.mrb[76].mxu1 }
 0x19b   : > { %v5806_v43 = vadd.f32 %v1351_v22, %v5718_v27  ;;  %v5809_v45 = vadd.f32 %v1576_v38, %v5685_v36  ;;  %v4401_v46 = vpop.f32.mrb[77].mxu0  ;;  %v4423_v18 = vpop.f32.mrb[77].mxu1  ;;  %v4988_v38 = vld [vmem:[%s5269_s24 + $0x90] sm:$0xff]  }
 0x19c   : > { %v1354_v28 = vpop.f32.mrb[78].mxu0  ;;  %v1579_v50 = vpop.f32.mrb[78].mxu1  ;;  %v4989_v46 = vld [vmem:[%s5269_s24 + $0x70] sm:$0xff]  }
 0x19d   : > { %v5814_v51 = vadd.f32 %v1354_v28, %v5726_v40  ;;  %v5817_v54 = vadd.f32 %v1579_v50, %v5693_v63  ;;  %v4402_v55 = vpop.f32.mrb[79].mxu0  ;;  %v4424_v27 = vpop.f32.mrb[79].mxu1  ;;  %v4982_v63 = vld [vmem:[%s5269_s24 + $0xb0] sm:$0xff]  }
 0x19f   : > { %4620 = vmatmul.mubr.msk.bf16.gmra.mrb[184].mxu0 %vm699_vm3, %v4980_v48  ;;  %4642 = vmatmul.mubr.msk.bf16.gmra.mrb[184].mxu1 %vm699_vm3, %v4981_v39 }
 0x1a0   : > { %4623 = vmatprep.mubr.msk.bf16.mxu0 %vm5083_vm2, %v5081_v26  ;;  %4645 = vmatprep.mubr.msk.bf16.mxu1 %vm5083_vm2, %v5081_v26 }
 0x1a2   : > { %v1359_v36 = vpop.f32.mrb[80].mxu0  ;;  %v1584_v59 = vpop.f32.mrb[80].mxu1 }
 0x1a3   : > { %v5826_v40 = vadd.f32 %v1359_v36, %v5738_v52  ;;  %v4405_v56 = vpop.f32.mrb[81].mxu0  ;;  %v4427_v0 = vpop.f32.mrb[81].mxu1  ;;  %v4990_v59 = vld [vmem:[%s5269_s24 + $0x98] sm:$0xff]  }
 0x1a4   : > { %v1362_v53 = vpop.f32.mrb[82].mxu0  ;;  %v1586_v41 = vpop.f32.mrb[82].mxu1  ;;  %v4991_v56 = vld [vmem:[%s5269_s24 + $0x78] sm:$0xff]  }
 0x1a5   : > { %v5831_v1 = vadd.f32 %v1362_v53, %v5746_v57  ;;  %v4406_v3 = vpop.f32.mrb[83].mxu0  ;;  %v4428_v60 = vpop.f32.mrb[83].mxu1 }
 0x1a7   : > { %4624 = vmatmul.mubr.msk.bf16.gmra.mrb[188].mxu0 %vm699_vm3, %v4982_v63  ;;  %4646 = vmatmul.mubr.msk.bf16.gmra.mrb[188].mxu1 %vm699_vm3, %v4983_v34 }
 0x1a8   : > { %4649 = vmatprep.mubr.msk.bf16.mxu1 %vm5083_vm2, %v5081_v26  ;;  %4683 = vmatprep.mubr.msk.bf16.mxu0 %vm5083_vm2, %v5081_v26 }
 0x1aa   : > { %v1367_v52 = vpop.f32.mrb[84].mxu0  ;;  %v1590_v49 = vpop.f32.mrb[84].mxu1 }
 0x1ab   : > { %v5840_v6 = vadd.f32 %v1367_v52, %v5758_v62  ;;  %v4409_v2 = vpop.f32.mrb[85].mxu0  ;;  %v4431_v57 = vpop.f32.mrb[85].mxu1 }
 0x1ac   : > { %v1370_v8 = vpop.f32.mrb[86].mxu0  ;;  %v1592_v61 = vpop.f32.mrb[86].mxu1 }
 0x1ad   : > { %v5845_v10 = vadd.f32 %v1370_v8, %v5766_v4  ;;  %v4410_v11 = vpop.f32.mrb[87].mxu0  ;;  %v4432_v12 = vpop.f32.mrb[87].mxu1 }
 0x1ae   : > { %v4994_v12 = vld [vmem:[%s5269_s24 + $0xa8] sm:$0xff]  }
 0x1af   : > { %4650 = vmatmul.mubr.msk.bf16.gmra.mrb[192].mxu1 %vm699_vm3, %v4984_v47  ;;  %4684 = vmatmul.mubr.msk.bf16.vlgmr.msra.gmra.mrb[192].mxu0 %vm699_vm3, %v4985_v7 }
 0x1b0   : > { %4653 = vmatprep.mubr.msk.bf16.mxu1 %vm5083_vm2, %v5081_v26  ;;  %4687 = vmatprep.mubr.msk.bf16.mxu0 %vm5083_vm2, %v5081_v26 }
 0x1b2   : > { %v1596_v62 = vpop.f32.mrb[88].mxu1  ;;  %v1841_v13 = vpop.f32.mrb[88].mxu0 }
 0x1b3   : > { %v5854_v16 = vadd.f32 %v1596_v62, %v5721_v32  ;;  %v5857_v4 = vadd.f32 %v1841_v13, %v5778_v9  ;;  %v4435_v17 = vpop.f32.mrb[89].mxu1  ;;  %v4469_v29 = vpop.f32.mrb[89].mxu0  ;;  %v4995_v62 = vld [vmem:[%s5269_s24 + $0x88] sm:$0xff]  }
 0x1b4   : > { %v1599_v31 = vpop.f32.mrb[90].mxu1  ;;  %v1844_v23 = vpop.f32.mrb[90].mxu0 }
 0x1b5   : > { %v5862_v24 = vadd.f32 %v1599_v31, %v5729_v42  ;;  %v5865_v25 = vadd.f32 %v1844_v23, %v5783_v14  ;;  %v4470_v15 = vpop.f32.mrb[91].mxu0  ;;  %v4436_v32 = vpop.f32.mrb[91].mxu1 }
 0x1b7   : > { %4654 = vmatmul.mubr.msk.bf16.gmra.mrb[196].mxu1 %vm699_vm3, %v4986_v19  ;;  %4688 = vmatmul.mubr.msk.bf16.gmra.mrb[196].mxu0 %vm699_vm3, %v4987_v21 }
 0x1b8   : > { %4657 = vmatprep.mubr.msk.bf16.mxu1 %vm5083_vm2, %v5081_v26  ;;  %4691 = vmatprep.mubr.msk.bf16.mxu0 %vm5083_vm2, %v5081_v26 }
 0x1ba   : > { %v1604_v9 = vpop.f32.mrb[92].mxu1  ;;  %v1849_v35 = vpop.f32.mrb[92].mxu0 }
 0x1bb   : > { %v5874_v42 = vadd.f32 %v1604_v9, %v5741_v30  ;;  %v5877_v14 = vadd.f32 %v1849_v35, %v5792_v20  ;;  %v4439_v37 = vpop.f32.mrb[93].mxu1  ;;  %v4473_v22 = vpop.f32.mrb[93].mxu0  ;;  %v4996_v35 = vld [vmem:[%s5269_s24 + $0xb0] sm:$0xff]  }
 0x1bc   : > { %v1607_v18 = vpop.f32.mrb[94].mxu1  ;;  %v1852_v48 = vpop.f32.mrb[94].mxu0  ;;  %v4997_v37 = vld [vmem:[%s5269_s24 + $0x90] sm:$0xff]  }
 0x1bd   : > { %v5882_v39 = vadd.f32 %v1607_v18, %v5749_v58  ;;  %v5885_v28 = vadd.f32 %v1852_v48, %v5797_v33  ;;  %v4474_v50 = vpop.f32.mrb[95].mxu0  ;;  %v4440_v30 = vpop.f32.mrb[95].mxu1 }
 0x1bf   : > { %4658 = vmatmul.mubr.msk.bf16.gmra.mrb[200].mxu1 %vm699_vm3, %v4988_v38  ;;  %4692 = vmatmul.mubr.msk.bf16.gmra.mrb[200].mxu0 %vm699_vm3, %v4989_v46 }
 0x1c0   : > { %4661 = vmatprep.mubr.msk.bf16.mxu1 %vm5083_vm2, %v5081_v26  ;;  %4695 = vmatprep.mubr.msk.bf16.mxu0 %vm5083_vm2, %v5081_v26 }
 0x1c2   : > { %v1612_v20 = vpop.f32.mrb[96].mxu1  ;;  %v1857_v55 = vpop.f32.mrb[96].mxu0 }
 0x1c3   : > { %v5894_v58 = vadd.f32 %v1612_v20, %v5761_v44  ;;  %v5897_v33 = vadd.f32 %v1857_v55, %v5809_v45  ;;  %v4443_v27 = vpop.f32.mrb[97].mxu1  ;;  %v4477_v36 = vpop.f32.mrb[97].mxu0  ;;  %v4998_v55 = vld [vmem:[%s5269_s24 + $0xb8] sm:$0xff]  }
 0x1c4   : > { %v1615_v63 = vpop.f32.mrb[98].mxu1  ;;  %v1860_v34 = vpop.f32.mrb[98].mxu0  ;;  %v4999_v27 = vld [vmem:[%s5269_s24 + $0x98] sm:$0xff]  }
 0x1c5   : > { %v5902_v0 = vadd.f32 %v1615_v63, %v5769_v5  ;;  %v5905_v53 = vadd.f32 %v1860_v34, %v5817_v54  ;;  %v4478_v41 = vpop.f32.mrb[99].mxu0  ;;  %v4444_v44 = vpop.f32.mrb[99].mxu1  ;;  %v4992_v5 = vld [vmem:[%s5269_s24 + $0xa0] sm:$0xff]  }
 0x1c6   : > { %v4993_v54 = vld [vmem:[%s5269_s24 + $0x80] sm:$0xff]  }
 0x1c7   : > { %4662 = vmatmul.mubr.msk.bf16.gmra.mrb[204].mxu1 %vm699_vm3, %v4990_v59  ;;  %4696 = vmatmul.mubr.msk.bf16.gmra.mrb[204].mxu0 %vm699_vm3, %v4991_v56 }
 0x1c8   : > { %4665 = vmatprep.mubr.msk.bf16.mxu1 %vm5083_vm2, %v5081_v26  ;;  %4699 = vmatprep.mubr.msk.bf16.mxu0 %vm5083_vm2, %v5081_v26 }
 0x1ca   : > { %v1865_v45 = vpop.f32.mrb[100].mxu0  ;;  %v1620_v3 = vpop.f32.mrb[100].mxu1 }
 0x1cb   : > { %v4481_v60 = vpop.f32.mrb[101].mxu0  ;;  %v4447_v52 = vpop.f32.mrb[101].mxu1  ;;  %v5000_v3 = vld [vmem:[%s5269_s24 + $0xa0] sm:$0xff]  }
 0x1cc   : > { %v1867_v49 = vpop.f32.mrb[102].mxu0  ;;  %v1622_v2 = vpop.f32.mrb[102].mxu1 }
 0x1cd   : > { %v4482_v57 = vpop.f32.mrb[103].mxu0  ;;  %v4448_v47 = vpop.f32.mrb[103].mxu1 }
 0x1cf   : > { %4666 = vmatmul.mubr.msk.bf16.gmra.mrb[208].mxu1 %vm699_vm3, %v4992_v5  ;;  %4700 = vmatmul.mubr.msk.bf16.gmra.mrb[208].mxu0 %vm699_vm3, %v4993_v54 }
 0x1d0   : > { %4669 = vmatprep.mubr.msk.bf16.mxu1 %vm5083_vm2, %v5081_v26  ;;  %4703 = vmatprep.mubr.msk.bf16.mxu0 %vm5083_vm2, %v5081_v26 }
 0x1d2   : > { %v1871_v7 = vpop.f32.mrb[104].mxu0  ;;  %v1626_v8 = vpop.f32.mrb[104].mxu1 }
 0x1d3   : > { %v4485_v61 = vpop.f32.mrb[105].mxu0  ;;  %v4451_v11 = vpop.f32.mrb[105].mxu1 }
 0x1d4   : > { %v1873_v13 = vpop.f32.mrb[106].mxu0  ;;  %v1628_v17 = vpop.f32.mrb[106].mxu1 }
 0x1d5   : > { %v4486_v29 = vpop.f32.mrb[107].mxu0  ;;  %v4452_v19 = vpop.f32.mrb[107].mxu1 }
 0x1d6   : > { %v5002_v19 = vld [vmem:[%s5269_s24 + $0xb0] sm:$0xff]  }
 0x1d7   : > { %4670 = vmatmul.mubr.msk.bf16.gmra.mrb[212].mxu1 %vm699_vm3, %v4994_v12  ;;  %4704 = vmatmul.mubr.msk.bf16.gmra.mrb[212].mxu0 %vm699_vm3, %v4995_v62 }
 0x1d8   : > { %4673 = vmatprep.mubr.msk.bf16.mxu1 %vm5083_vm2, %v5081_v26  ;;  %4707 = vmatprep.mubr.msk.bf16.mxu0 %vm5083_vm2, %v5081_v26 }
 0x1da   : > { %v1632_v21 = vpop.f32.mrb[108].mxu1  ;;  %v1877_v31 = vpop.f32.mrb[108].mxu0 }
 0x1db   : > { %v5930_v23 = vadd.f32 %v1632_v21, %v5806_v43  ;;  %v5933_v15 = vadd.f32 %v1877_v31, %v5854_v16  ;;  %v4455_v32 = vpop.f32.mrb[109].mxu1  ;;  %v4489_v9 = vpop.f32.mrb[109].mxu0 }
 0x1dc   : > { %v1635_v22 = vpop.f32.mrb[110].mxu1  ;;  %v1880_v38 = vpop.f32.mrb[110].mxu0 }
 0x1dd   : > { %v5938_v46 = vadd.f32 %v1635_v22, %v5814_v51  ;;  %v5941_v18 = vadd.f32 %v1880_v38, %v5862_v24  ;;  %v4490_v48 = vpop.f32.mrb[111].mxu0  ;;  %v4456_v43 = vpop.f32.mrb[111].mxu1 }
 0x1df   : > { %4674 = vmatmul.mubr.msk.bf16.gmra.mrb[216].mxu1 %vm699_vm3, %v4996_v35  ;;  %4708 = vmatmul.mubr.msk.bf16.gmra.mrb[216].mxu0 %vm699_vm3, %v4997_v37 }
 0x1e0   : > { %4677 = vmatprep.mubr.msk.bf16.mxu1 %vm5083_vm2, %v5081_v26  ;;  %4711 = vmatprep.mubr.msk.bf16.mxu0 %vm5083_vm2, %v5081_v26 }
 0x1e2   : > { %v1640_v16 = vpop.f32.mrb[112].mxu1  ;;  %v1885_v50 = vpop.f32.mrb[112].mxu0 }
 0x1e3   : > { %v5950_v51 = vadd.f32 %v1640_v16, %v5826_v40  ;;  %v5953_v24 = vadd.f32 %v1885_v50, %v5874_v42  ;;  %v4459_v30 = vpop.f32.mrb[113].mxu1  ;;  %v4493_v20 = vpop.f32.mrb[113].mxu0 }
 0x1e4   : > { %v1643_v36 = vpop.f32.mrb[114].mxu1  ;;  %v1888_v59 = vpop.f32.mrb[114].mxu0 }
 0x1e5   : > { %v5958_v56 = vadd.f32 %v1643_v36, %v5831_v1  ;;  %v5961_v63 = vadd.f32 %v1888_v59, %v5882_v39  ;;  %v4494_v34 = vpop.f32.mrb[115].mxu0  ;;  %v4460_v41 = vpop.f32.mrb[115].mxu1 }
 0x1e7   : > { %4678 = vmatmul.mubr.msk.bf16.gmra.mrb[220].mxu1 %vm699_vm3, %v4998_v55  ;;  %4712 = vmatmul.mubr.msk.bf16.gmra.mrb[220].mxu0 %vm699_vm3, %v4999_v27 }
 0x1e8   : > { %4715 = vmatprep.mubr.msk.bf16.mxu0 %vm5083_vm2, %v5081_v26 }
 0x1ea   : > { %v1648_v40 = vpop.f32.mrb[116].mxu1  ;;  %v1893_v42 = vpop.f32.mrb[116].mxu0 }
 0x1eb   : > { %v5968_v44 = vadd.f32 %v1648_v40, %v5840_v6  ;;  %v5971_v1 = vadd.f32 %v1893_v42, %v5894_v58  ;;  %v4463_v45 = vpop.f32.mrb[117].mxu1  ;;  %v4497_v39 = vpop.f32.mrb[117].mxu0 }
 0x1ec   : > { %v1651_v60 = vpop.f32.mrb[118].mxu1  ;;  %v1896_v5 = vpop.f32.mrb[118].mxu0 }
 0x1ed   : > { %v5975_v54 = vadd.f32 %v1651_v60, %v5845_v10  ;;  %v5978_v52 = vadd.f32 %v1896_v5, %v5902_v0  ;;  %v4498_v49 = vpop.f32.mrb[119].mxu0  ;;  %v4464_v2 = vpop.f32.mrb[119].mxu1  ;;  %v5001_v10 = vld [vmem:[%s5269_s24 + $0xa8] sm:$0xff]  }
 0x1ef   : > { %4716 = vmatmul.mubr.msk.bf16.gmra.mrb[224].mxu0 %vm699_vm3, %v5000_v3 }
 0x1f0   : > { %4719 = vmatprep.mubr.msk.bf16.mxu0 %vm5083_vm2, %v5081_v26 }
 0x1f2   : > { %v1901_v6 = vpop.f32.mrb[120].mxu0  ;;  %v2122_v58 = vpop.f32.mrb[120].mxu1 }
 0x1f3   : > { %v5984_v57 = vadd.f32 %v2122_v58, %v5857_v4  ;;  %v4501_v47 = vpop.f32.mrb[121].mxu0  ;;  %v4523_v7 = vpop.f32.mrb[121].mxu1 }
 0x1f4   : > { %v1903_v8 = vpop.f32.mrb[122].mxu0  ;;  %v2125_v61 = vpop.f32.mrb[122].mxu1 }
 0x1f5   : > { %v5988_v0 = vadd.f32 %v2125_v61, %v5865_v25  ;;  %v4502_v11 = vpop.f32.mrb[123].mxu0  ;;  %v4524_v12 = vpop.f32.mrb[123].mxu1 }
 0x1f7   : > { %4720 = vmatmul.mubr.msk.bf16.gmra.mrb[228].mxu0 %vm699_vm3, %v5001_v10 }
 0x1f8   : > { %4723 = vmatprep.mubr.msk.bf16.mxu0 %vm5083_vm2, %v5081_v26 }
 0x1fa   : > { %v1907_v62 = vpop.f32.mrb[124].mxu0  ;;  %v2130_v13 = vpop.f32.mrb[124].mxu1 }
 0x1fb   : > { %v5994_v4 = vadd.f32 %v2130_v13, %v5877_v14  ;;  %v4505_v17 = vpop.f32.mrb[125].mxu0  ;;  %v4527_v29 = vpop.f32.mrb[125].mxu1 }
 0x1fc   : > { %v1909_v21 = vpop.f32.mrb[126].mxu0  ;;  %v2133_v31 = vpop.f32.mrb[126].mxu1  ;;  %v4084_v17 = vld [vmem:[%s6262_s3 + $0x8] sm:$0xff]  }
 0x1fd   : > { %v5998_v25 = vadd.f32 %v2133_v31, %v5885_v28  ;;  %v4506_v32 = vpop.f32.mrb[127].mxu0  ;;  %v4528_v9 = vpop.f32.mrb[127].mxu1  ;;  %v5003_v28 = vld [vmem:[%s5269_s24 + $0xb8] sm:$0xff]  }
 0x1ff   : > { %4724 = vmatmul.mubr.msk.bf16.gmra.mrb[232].mxu0 %vm699_vm3, %v5002_v19 }
 0x200   : > { %4727 = vmatprep.mubr.msk.bf16.mxu0 %vm5083_vm2, %v5081_v26 }
 0x202   : > { %v1913_v35 = vpop.f32.mrb[128].mxu0  ;;  %v2138_v37 = vpop.f32.mrb[128].mxu1 }
 0x203   : > { %v6004_v14 = vadd.f32 %v1913_v35, %v5930_v23  ;;  %v6007_v22 = vadd.f32 %v2138_v37, %v5897_v33  ;;  %v4509_v38 = vpop.f32.mrb[129].mxu0  ;;  %v4531_v48 = vpop.f32.mrb[129].mxu1  ;;  %v4037_v33 = vld [vmem:[%s6262_s3] sm:$0xff]  }
 0x204   : > { %v1916_v43 = vpop.f32.mrb[130].mxu0  ;;  %v2141_v16 = vpop.f32.mrb[130].mxu1  ;;  %4793 = vmatprep.subr.bf16.mxu1 %v4037_v33 }
 0x205   : > { %v6011_v50 = vadd.f32 %v1916_v43, %v5938_v46  ;;  %v6014_v30 = vadd.f32 %v2141_v16, %v5905_v53  ;;  %v4510_v20 = vpop.f32.mrb[131].mxu0  ;;  %v4532_v55 = vpop.f32.mrb[131].mxu1  ;;  %v5004_v53 = vld [vmem:[%s5269_s24 + $0xc0] sm:$0xff]   ;;  %4795 = vmatpush3.bf16.msra.mxu1 %v4037_v33  ;;  %s3502_s24 = sshll.u32 %s568_s28, 4  ;;  %s6215_s24 = int_to_ptr.vmem [resolvable:$true] %s3502_s24 }
 0x206   : > { %4797 = vmatprep.subr.bf16.mxu1 %v4084_v17  ;;  %s5017_s21 = scalar_lea.vmem %s6215_s24, 256  ;;  %p5024_p2 = scmp.lt.s32.totalorder %s6215_s24, %s5022_s23 }
 0x207   : > { %4728 = vmatmul.mubr.msk.bf16.gmra.mrb[236].mxu0 %vm699_vm3, %v5003_v28  ;;  %p5018_p13 = scmp.ne.s32.totalorder %s6215_s24, %s5017_s21  ;;  %p5025_p3 = scmp.lt.s32.totalorder %s5023_s25, %s5017_s21 }
 0x208   : > { %4731 = vmatprep.mubr.msk.bf16.mxu0 %vm5083_vm2, %v5081_v26 }
 0x209   : > { %4799 = vmatpush3.bf16.msra.mxu1 %v4084_v17  ;;  %p5019_p0 = pnand %p5018_p13, %p5175_p6  ;;  %p5026_p4 = por %p5025_p3, %p5024_p2 }
 0x20a   : > { %v1921_v23 = vpop.f32.mrb[132].mxu0  ;;  %v2146_v27 = vpop.f32.mrb[132].mxu1 }
 0x20b   : > { %v6023_v46 = vadd.f32 %v1921_v23, %v5950_v51  ;;  %v4513_v36 = vpop.f32.mrb[133].mxu0  ;;  %v4535_v59 = vpop.f32.mrb[133].mxu1  ;;  %p5020_p1 = pneg %p5019_p0 }
 0x20c   : > { %v1924_v34 = vpop.f32.mrb[134].mxu0  ;;  %v2148_v41 = vpop.f32.mrb[134].mxu1 }
 0x20d   : > { %v6027_v40 = vadd.f32 %v1924_v34, %v5958_v56  ;;  %v4514_v26 = vpop.f32.mrb[135].mxu0  ;;  %v4536_v42 = vpop.f32.mrb[135].mxu1  ;;  %p5027_p5 = pnand %p5026_p4, %p5020_p1 }
 0x20f   : > { %4732 = vmatmul.mubr.msk.bf16.gmra.mrb[240].mxu0 %vm699_vm3, %v5004_v53 }
 0x212   : > { %v1929_v45 = vpop.f32.mrb[136].mxu0  ;;  %v2152_v39 = vpop.f32.mrb[136].mxu1 }
 0x213   : > { %v6031_v3 = vadd.f32 %v1929_v45, %v5968_v44  ;;  %v4517_v51 = vpop.f32.mrb[137].mxu0  ;;  %v4539_v60 = vpop.f32.mrb[137].mxu1 }
 0x214   : > { %v1932_v5 = vpop.f32.mrb[138].mxu0  ;;  %v2154_v49 = vpop.f32.mrb[138].mxu1 }
 0x215   : > { %v6034_v2 = vadd.f32 %v1932_v5, %v5975_v54  ;;  %v4518_v6 = vpop.f32.mrb[139].mxu0  ;;  %v4540_v58 = vpop.f32.mrb[139].mxu1 }
 0x21a   : > { %v2158_v56 = vpop.f32.mrb[140].mxu1  ;;  %v2403_v47 = vpop.f32.mrb[140].mxu0 }
 0x21b   : > { %v2223_v7 = vadd.f32 %v2158_v56, %v5933_v15  ;;  %v6038_v10 = vadd.f32 %v2403_v47, %v5984_v57  ;;  %v4543_v8 = vpop.f32.mrb[141].mxu1  ;;  %v4577_v61 = vpop.f32.mrb[141].mxu0 }
 0x21c   : > { %v2161_v44 = vpop.f32.mrb[142].mxu1  ;;  %v2406_v11 = vpop.f32.mrb[142].mxu0 }
 0x21d   : > { %v2224_v12 = vadd.f32 %v2161_v44, %v5941_v18  ;;  %v6042_v62 = vadd.f32 %v2406_v11, %v5988_v0  ;;  %v4578_v54 = vpop.f32.mrb[143].mxu0  ;;  %v4544_v13 = vpop.f32.mrb[143].mxu1 }
 0x222   : > { %v2166_v15 = vpop.f32.mrb[144].mxu1  ;;  %v2411_v57 = vpop.f32.mrb[144].mxu0 }
 0x223   : > { %v2225_v29 = vadd.f32 %v2166_v15, %v5953_v24  ;;  %v6049_v19 = vadd.f32 %v2411_v57, %v5994_v4  ;;  %v4547_v21 = vpop.f32.mrb[145].mxu1  ;;  %v4581_v18 = vpop.f32.mrb[145].mxu0 }
 0x224   : > { %v2169_v31 = vpop.f32.mrb[146].mxu1  ;;  %v2414_v0 = vpop.f32.mrb[146].mxu0 }
 0x225   : > { %v2226_v32 = vadd.f32 %v2169_v31, %v5961_v63  ;;  %v6053_v9 = vadd.f32 %v2414_v0, %v5998_v25  ;;  %v4582_v35 = vpop.f32.mrb[147].mxu0  ;;  %v4548_v37 = vpop.f32.mrb[147].mxu1 }
 0x22a   : > { %v2174_v38 = vpop.f32.mrb[148].mxu1  ;;  %v2419_v48 = vpop.f32.mrb[148].mxu0 }
 0x22b   : > { %v2227_v28 = vadd.f32 %v2174_v38, %v5971_v1  ;;  %v6057_v24 = vadd.f32 %v2419_v48, %v6007_v22  ;;  %v4551_v4 = vpop.f32.mrb[149].mxu1  ;;  %v4585_v43 = vpop.f32.mrb[149].mxu0 }
 0x22c   : > { %v2177_v16 = vpop.f32.mrb[150].mxu1  ;;  %v2422_v20 = vpop.f32.mrb[150].mxu0 }
 0x22d   : > { %v2228_v55 = vadd.f32 %v2177_v16, %v5978_v52  ;;  %v6061_v63 = vadd.f32 %v2422_v20, %v6014_v30  ;;  %v4586_v25 = vpop.f32.mrb[151].mxu0  ;;  %v4552_v33 = vpop.f32.mrb[151].mxu1  ;;  %v4085_v30 = vld [vmem:[%s6262_s3 + $0x10] sm:$0xff]  }
 0x22e   : > { %4801 = vmatprep.subr.bf16.mxu1 %v4085_v30 }
 0x22f   : > { %4803 = vmatpush3.bf16.msra.mxu1 %v4085_v30 }
 0x232   : > { %v2427_v23 = vpop.f32.mrb[152].mxu0  ;;  %v2182_v27 = vpop.f32.mrb[152].mxu1 }
 0x233   : > { %v4589_v36 = vpop.f32.mrb[153].mxu0  ;;  %v4555_v53 = vpop.f32.mrb[153].mxu1 }
 0x234   : > { %v2429_v59 = vpop.f32.mrb[154].mxu0  ;;  %v2184_v1 = vpop.f32.mrb[154].mxu1 }
 0x235   : > { %v4590_v34 = vpop.f32.mrb[155].mxu0  ;;  %v4556_v22 = vpop.f32.mrb[155].mxu1 }
 0x23a   : > { %v2433_v41 = vpop.f32.mrb[156].mxu0  ;;  %v2188_v26 = vpop.f32.mrb[156].mxu1 }
 0x23b   : > { %v4593_v42 = vpop.f32.mrb[157].mxu0  ;;  %v4559_v45 = vpop.f32.mrb[157].mxu1 }
 0x23c   : > { %v2435_v39 = vpop.f32.mrb[158].mxu0  ;;  %v2190_v51 = vpop.f32.mrb[158].mxu1 }
 0x23d   : > { %v4594_v52 = vpop.f32.mrb[159].mxu0  ;;  %v4560_v60 = vpop.f32.mrb[159].mxu1 }
 0x242   : > { %v2194_v5 = vpop.f32.mrb[160].mxu1  ;;  %v2439_v49 = vpop.f32.mrb[160].mxu0 }
 0x243   : > { %v2229_v6 = vadd.f32 %v2194_v5, %v6004_v14  ;;  %v6067_v58 = vadd.f32 %v2439_v49, %v2223_v7  ;;  %v4563_v56 = vpop.f32.mrb[161].mxu1  ;;  %v4597_v47 = vpop.f32.mrb[161].mxu0 }
 0x244   : > { %v2197_v8 = vpop.f32.mrb[162].mxu1  ;;  %v2442_v61 = vpop.f32.mrb[162].mxu0 }
 0x245   : > { %v2230_v44 = vadd.f32 %v2197_v8, %v6011_v50  ;;  %v6070_v11 = vadd.f32 %v2442_v61, %v2224_v12  ;;  %v4598_v54 = vpop.f32.mrb[163].mxu0  ;;  %v4564_v13 = vpop.f32.mrb[163].mxu1 }
 0x246   : > { %v6104_v13 = vld [vmem:[%s6264_s5] sm:$0xff]  }
 0x24a   : > { %v2202_v17 = vpop.f32.mrb[164].mxu1  ;;  %v2447_v15 = vpop.f32.mrb[164].mxu0 }
 0x24b   : > { %v2231_v57 = vadd.f32 %v2202_v17, %v6023_v46  ;;  %v6073_v21 = vadd.f32 %v2447_v15, %v2225_v29  ;;  %v4567_v14 = vpop.f32.mrb[165].mxu1  ;;  %v4601_v7 = vpop.f32.mrb[165].mxu0 }
 0x24c   : > { %v2205_v18 = vpop.f32.mrb[166].mxu1  ;;  %v2450_v31 = vpop.f32.mrb[166].mxu0 }
 0x24d   : > { %v2232_v0 = vadd.f32 %v2205_v18, %v6027_v40  ;;  %v6076_v35 = vadd.f32 %v2450_v31, %v2226_v32  ;;  %v4602_v37 = vpop.f32.mrb[167].mxu0  ;;  %v4568_v50 = vpop.f32.mrb[167].mxu1 }
 0x252   : > { %v2210_v12 = vpop.f32.mrb[168].mxu1  ;;  %v2455_v38 = vpop.f32.mrb[168].mxu0 }
 0x253   : > { %v2233_v48 = vadd.f32 %v2210_v12, %v6031_v3  ;;  %v6079_v4 = vadd.f32 %v2455_v38, %v2227_v28  ;;  %v4571_v43 = vpop.f32.mrb[169].mxu1  ;;  %v4605_v46 = vpop.f32.mrb[169].mxu0  ;;  %v4086_v3 = vld [vmem:[%s6262_s3 + $0x18] sm:$0xff]  }
 0x254   : > { %v2213_v29 = vpop.f32.mrb[170].mxu1  ;;  %v2458_v16 = vpop.f32.mrb[170].mxu0  ;;  %4805 = vmatprep.subr.bf16.mxu1 %v4086_v3 }
 0x255   : > { %v2234_v20 = vadd.f32 %v2213_v29, %v6034_v2  ;;  %v6082_v25 = vadd.f32 %v2458_v16, %v2228_v55  ;;  %v4606_v33 = vpop.f32.mrb[171].mxu0  ;;  %v4572_v40 = vpop.f32.mrb[171].mxu1  ;;  %4807 = vmatpush3.bf16.msra.mxu1 %v4086_v3 }
 0x256   : > { %4809 = vmatprep.subr.bf16.mxu1 %v6104_v13 }
 0x25a   : > { %v2463_v32 = vpop.f32.mrb[172].mxu0  ;;  %v2684_v23 = vpop.f32.mrb[172].mxu1 }
 0x25b   : > { %v2779_v27 = vadd.f32 %v2684_v23, %v6038_v10  ;;  %v4609_v36 = vpop.f32.mrb[173].mxu0  ;;  %v4631_v53 = vpop.f32.mrb[173].mxu1 }
 0x25c   : > { %v2465_v28 = vpop.f32.mrb[174].mxu0  ;;  %v2687_v59 = vpop.f32.mrb[174].mxu1 }
 0x25d   : > { %v2780_v1 = vadd.f32 %v2687_v59, %v6042_v62  ;;  %v4610_v2 = vpop.f32.mrb[175].mxu0  ;;  %v4632_v55 = vpop.f32.mrb[175].mxu1 }
 0x262   : > { %v2469_v34 = vpop.f32.mrb[176].mxu0  ;;  %v2692_v22 = vpop.f32.mrb[176].mxu1 }
 0x263   : > { %v2781_v41 = vadd.f32 %v2692_v22, %v6049_v19  ;;  %v4613_v26 = vpop.f32.mrb[177].mxu0  ;;  %v4635_v10 = vpop.f32.mrb[177].mxu1 }
 0x264   : > { %v2471_v42 = vpop.f32.mrb[178].mxu0  ;;  %v2695_v45 = vpop.f32.mrb[178].mxu1 }
 0x265   : > { %v2782_v39 = vadd.f32 %v2695_v45, %v6053_v9  ;;  %v4614_v51 = vpop.f32.mrb[179].mxu0  ;;  %v4636_v52 = vpop.f32.mrb[179].mxu1 }
 0x26a   : > { %v2475_v60 = vpop.f32.mrb[180].mxu0  ;;  %v2700_v30 = vpop.f32.mrb[180].mxu1 }
 0x26b   : > { %v6091_v5 = vadd.f32 %v2475_v60, %v2229_v6  ;;  %v6094_v62 = vadd.f32 %v2700_v30, %v6057_v24  ;;  %v4617_v49 = vpop.f32.mrb[181].mxu0  ;;  %v4639_v56 = vpop.f32.mrb[181].mxu1 }
 0x26c   : > { %v2478_v47 = vpop.f32.mrb[182].mxu0  ;;  %v2703_v8 = vpop.f32.mrb[182].mxu1 }
 0x26d   : > { %v6096_v19 = vadd.f32 %v2478_v47, %v2230_v44  ;;  %v6099_v61 = vadd.f32 %v2703_v8, %v6061_v63  ;;  %v4618_v54 = vpop.f32.mrb[183].mxu0  ;;  %v4640_v9 = vpop.f32.mrb[183].mxu1 }
 0x272   : > { %v2483_v24 = vpop.f32.mrb[184].mxu0  ;;  %v2708_v6 = vpop.f32.mrb[184].mxu1 }
 0x273   : > { %v6107_v17 = vadd.f32 %v2483_v24, %v2231_v57  ;;  %v4621_v15 = vpop.f32.mrb[185].mxu0  ;;  %v4643_v14 = vpop.f32.mrb[185].mxu1 }
 0x274   : > { %v2486_v44 = vpop.f32.mrb[186].mxu0  ;;  %v2710_v7 = vpop.f32.mrb[186].mxu1 }
 0x275   : > { %v6109_v18 = vadd.f32 %v2486_v44, %v2232_v0  ;;  %v4622_v63 = vpop.f32.mrb[187].mxu0  ;;  %v4644_v31 = vpop.f32.mrb[187].mxu1 }
 0x27a   : > { %v2491_v37 = vpop.f32.mrb[188].mxu0  ;;  %v2714_v50 = vpop.f32.mrb[188].mxu1 }
 0x27b   : > { %v6111_v12 = vadd.f32 %v2491_v37, %v2233_v48  ;;  %v4625_v38 = vpop.f32.mrb[189].mxu0  ;;  %v4647_v43 = vpop.f32.mrb[189].mxu1 }
 0x27c   : > { %v2494_v46 = vpop.f32.mrb[190].mxu0  ;;  %v2716_v29 = vpop.f32.mrb[190].mxu1 }
 0x27d   : > { %v6113_v16 = vadd.f32 %v2494_v46, %v2234_v20  ;;  %v4626_v57 = vpop.f32.mrb[191].mxu0  ;;  %v4648_v33 = vpop.f32.mrb[191].mxu1  ;;  %v6124_v20 = vld [vmem:[%s6261_s2] ss:$0 sm:$0xff] }
 0x282   : > { %v2720_v40 = vpop.f32.mrb[192].mxu1  ;;  %v2965_v32 = vpop.f32.mrb[192].mxu0 }
 0x283   : > { %v6116_v23 = vadd.f32 %v2720_v40, %v6067_v58  ;;  %v3060_v0 = vadd.f32 %v2965_v32, %v2779_v27  ;;  %v4651_v36 = vpop.f32.mrb[193].mxu1  ;;  %v4685_v53 = vpop.f32.mrb[193].mxu0 }
 0x284   : > { %v2723_v3 = vpop.f32.mrb[194].mxu1  ;;  %v2968_v28 = vpop.f32.mrb[194].mxu0 }
 0x285   : > { %v6119_v48 = vadd.f32 %v2723_v3, %v6070_v11  ;;  %v3061_v59 = vadd.f32 %v2968_v28, %v2780_v1  ;;  %v4686_v2 = vpop.f32.mrb[195].mxu0  ;;  %v4652_v55 = vpop.f32.mrb[195].mxu1  ;;  %v3085_v58 = vadd.f32 %v6124_v20, %v3060_v0 }
 0x287   : > { %v3086_v1 = vadd.f32 %v6124_v20, %v3061_v59  ;;  %v3103_v56 = vmax.f32 %v3085_v58, 0.0 }
 0x289   : > { %v3104_v8 = vmax.f32 %v3086_v1, 0.0 }
 0x28a   : > { %v2728_v34 = vpop.f32.mrb[196].mxu1  ;;  %v2973_v22 = vpop.f32.mrb[196].mxu0 }
 0x28b   : > { %v6128_v27 = vadd.f32 %v2728_v34, %v6073_v21  ;;  %v3062_v26 = vadd.f32 %v2973_v22, %v2781_v41  ;;  %v4655_v10 = vpop.f32.mrb[197].mxu1  ;;  %v4689_v42 = vpop.f32.mrb[197].mxu0 }
 0x28c   : > { %v2731_v11 = vpop.f32.mrb[198].mxu1  ;;  %v2976_v45 = vpop.f32.mrb[198].mxu0 }
 0x28d   : > { %v3087_v51 = vadd.f32 %v6124_v20, %v3062_v26  ;;  %v6133_v52 = vadd.f32 %v2731_v11, %v6076_v35  ;;  %v3063_v60 = vadd.f32 %v2976_v45, %v2782_v39  ;;  %v4690_v30 = vpop.f32.mrb[199].mxu0  ;;  %v4656_v49 = vpop.f32.mrb[199].mxu1 }
 0x28f   : > { %v3105_v47 = vmax.f32 %v3087_v51, 0.0  ;;  %v3088_v21 = vadd.f32 %v6124_v20, %v3063_v60 }
 0x291   : > { %v3121_v41 = vadd.f32 %v3105_v47, %v3103_v56  ;;  %v3106_v54 = vmax.f32 %v3088_v21, 0.0 }
 0x292   : > { %v2736_v9 = vpop.f32.mrb[200].mxu1  ;;  %v2981_v24 = vpop.f32.mrb[200].mxu0 }
 0x293   : > { %v3122_v6 = vadd.f32 %v3106_v54, %v3104_v8  ;;  %v6137_v15 = vadd.f32 %v2736_v9, %v6079_v4  ;;  %v3064_v14 = vadd.f32 %v2981_v24, %v6094_v62  ;;  %v4659_v35 = vpop.f32.mrb[201].mxu1  ;;  %v4693_v44 = vpop.f32.mrb[201].mxu0 }
 0x294   : > { %v2739_v39 = vpop.f32.mrb[202].mxu1  ;;  %v2984_v7 = vpop.f32.mrb[202].mxu0 }
 0x295   : > { %v3089_v63 = vadd.f32 %v6124_v20, %v3064_v14  ;;  %v6142_v31 = vadd.f32 %v2739_v39, %v6082_v25  ;;  %v3065_v37 = vadd.f32 %v2984_v7, %v6099_v61  ;;  %v4694_v50 = vpop.f32.mrb[203].mxu0  ;;  %v4660_v38 = vpop.f32.mrb[203].mxu1 }
 0x297   : > { %v3107_v43 = vmax.f32 %v3089_v63, 0.0  ;;  %v3090_v46 = vadd.f32 %v6124_v20, %v3065_v37 }
 0x299   : > { %v3123_v4 = vadd.f32 %v3121_v41, %v3107_v43  ;;  %v3108_v29 = vmax.f32 %v3090_v46, 0.0 }
 0x29a   : > { %v2989_v57 = vpop.f32.mrb[204].mxu0  ;;  %v2744_v62 = vpop.f32.mrb[204].mxu1 }
 0x29b   : > { %v3124_v33 = vadd.f32 %v3122_v6, %v3108_v29  ;;  %v4697_v40 = vpop.f32.mrb[205].mxu0  ;;  %v4663_v32 = vpop.f32.mrb[205].mxu1 }
 0x29c   : > { %v2991_v0 = vpop.f32.mrb[206].mxu0  ;;  %v2746_v36 = vpop.f32.mrb[206].mxu1 }
 0x29d   : > { %v4698_v53 = vpop.f32.mrb[207].mxu0  ;;  %v4664_v3 = vpop.f32.mrb[207].mxu1 }
 0x2a2   : > { %v2995_v25 = vpop.f32.mrb[208].mxu0  ;;  %v2750_v28 = vpop.f32.mrb[208].mxu1 }
 0x2a3   : > { %v4701_v59 = vpop.f32.mrb[209].mxu0  ;;  %v4667_v61 = vpop.f32.mrb[209].mxu1 }
 0x2a4   : > { %v2997_v2 = vpop.f32.mrb[210].mxu0  ;;  %v2752_v55 = vpop.f32.mrb[210].mxu1 }
 0x2a5   : > { %v4702_v34 = vpop.f32.mrb[211].mxu0  ;;  %v4668_v22 = vpop.f32.mrb[211].mxu1 }
 0x2aa   : > { %v2756_v58 = vpop.f32.mrb[212].mxu1  ;;  %v3001_v26 = vpop.f32.mrb[212].mxu0 }
 0x2ab   : > { %v2791_v10 = vadd.f32 %v2756_v58, %v6091_v5  ;;  %v3066_v42 = vadd.f32 %v3001_v26, %v6116_v23  ;;  %v4671_v11 = vpop.f32.mrb[213].mxu1  ;;  %v4705_v45 = vpop.f32.mrb[213].mxu0 }
 0x2ac   : > { %v2759_v1 = vpop.f32.mrb[214].mxu1  ;;  %v3004_v51 = vpop.f32.mrb[214].mxu0 }
 0x2ad   : > { %v3091_v60 = vadd.f32 %v6124_v20, %v3066_v42  ;;  %v2792_v30 = vadd.f32 %v2759_v1, %v6096_v19  ;;  %v3067_v49 = vadd.f32 %v3004_v51, %v6119_v48  ;;  %v4706_v56 = vpop.f32.mrb[215].mxu0  ;;  %v4672_v47 = vpop.f32.mrb[215].mxu1 }
 0x2af   : > { %v3109_v21 = vmax.f32 %v3091_v60, 0.0  ;;  %v3092_v8 = vadd.f32 %v6124_v20, %v3067_v49 }
 0x2b1   : > { %v3125_v41 = vadd.f32 %v3123_v4, %v3109_v21  ;;  %v3110_v54 = vmax.f32 %v3092_v8, 0.0 }
 0x2b2   : > { %v2764_v5 = vpop.f32.mrb[216].mxu1  ;;  %v3009_v9 = vpop.f32.mrb[216].mxu0 }
 0x2b3   : > { %v3126_v23 = vadd.f32 %v3124_v33, %v3110_v54  ;;  %v2793_v24 = vadd.f32 %v2764_v5, %v6107_v17  ;;  %v3068_v6 = vadd.f32 %v3009_v9, %v6128_v27  ;;  %v4675_v14 = vpop.f32.mrb[217].mxu1  ;;  %v4709_v35 = vpop.f32.mrb[217].mxu0 }
 0x2b4   : > { %v2767_v44 = vpop.f32.mrb[218].mxu1  ;;  %v3012_v19 = vpop.f32.mrb[218].mxu0 }
 0x2b5   : > { %v3093_v48 = vadd.f32 %v6124_v20, %v3068_v6  ;;  %v2794_v39 = vadd.f32 %v2767_v44, %v6109_v18  ;;  %v3069_v7 = vadd.f32 %v3012_v19, %v6133_v52  ;;  %v4710_v63 = vpop.f32.mrb[219].mxu0  ;;  %v4676_v37 = vpop.f32.mrb[219].mxu1 }
 0x2b7   : > { %v3111_v50 = vmax.f32 %v3093_v48, 0.0  ;;  %v3094_v38 = vadd.f32 %v6124_v20, %v3069_v7 }
 0x2b9   : > { %v3127_v43 = vadd.f32 %v3125_v41, %v3111_v50  ;;  %v3112_v46 = vmax.f32 %v3094_v38, 0.0 }
 0x2ba   : > { %v2772_v17 = vpop.f32.mrb[220].mxu1  ;;  %v3017_v4 = vpop.f32.mrb[220].mxu0 }
 0x2bb   : > { %v3128_v27 = vadd.f32 %v3126_v23, %v3112_v46  ;;  %v2795_v29 = vadd.f32 %v2772_v17, %v6111_v12  ;;  %v3070_v57 = vadd.f32 %v3017_v4, %v6137_v15  ;;  %v4679_v62 = vpop.f32.mrb[221].mxu1  ;;  %v4713_v33 = vpop.f32.mrb[221].mxu0 }
 0x2bc   : > { %v2775_v40 = vpop.f32.mrb[222].mxu1  ;;  %v3020_v18 = vpop.f32.mrb[222].mxu0  ;;  %v4069_v62 = vld [vmem:[%s6266_s7] sm:$0xff]  }
 0x2bd   : > { %v3095_v52 = vadd.f32 %v6124_v20, %v3070_v57  ;;  %v2796_v32 = vadd.f32 %v2775_v40, %v6113_v16  ;;  %v3071_v0 = vadd.f32 %v3020_v18, %v6142_v31  ;;  %v4714_v36 = vpop.f32.mrb[223].mxu0  ;;  %v4680_v53 = vpop.f32.mrb[223].mxu1  ;;  %v4089_v57 = vld [vmem:[%s6264_s5 + $0x18] sm:$0xff]  }
 0x2be   : > { %v4090_v36 = vld [vmem:[%s6266_s7 + $0x8] sm:$0xff]   ;;  %v4091_v53 = vld [vmem:[%s6266_s7 + $0x10] sm:$0xff]  }
 0x2bf   : > { %v3113_v3 = vmax.f32 %v3095_v52, 0.0  ;;  %v3096_v25 = vadd.f32 %v6124_v20, %v3071_v0 }
 0x2c1   : > { %v3129_v28 = vadd.f32 %v3127_v43, %v3113_v3  ;;  %v3114_v59 = vmax.f32 %v3096_v25, 0.0  ;;  %v4092_v3 = vld [vmem:[%s6266_s7 + $0x18] sm:$0xff]  }
 0x2c2   : > { %v3025_v12 = vpop.f32.mrb[224].mxu0 }
 0x2c3   : > { %v3130_v61 = vadd.f32 %v3128_v27, %v3114_v59  ;;  %v4717_v15 = vpop.f32.mrb[225].mxu0  ;;  %v4025_v59 = vld [vmem:[%s6265_s6] ss:$0 sm:$0xff] }
 0x2c4   : > { %v3027_v2 = vpop.f32.mrb[226].mxu0 }
 0x2c5   : > { %v4718_v55 = vpop.f32.mrb[227].mxu0 }
 0x2c6   : > { %v3458_v55 = vlaneseq }
 0x2ca   : > { %v3031_v34 = vpop.f32.mrb[228].mxu0 }
 0x2cb   : > { %v4721_v22 = vpop.f32.mrb[229].mxu0  ;;  %v3459_v34 = vand.u32 127, %v3458_v55 }
 0x2cc   : > { %v3033_v58 = vpop.f32.mrb[230].mxu0  ;;  %v4026_v22 = vld [vmem:[%s6267_s8] ss:$0 sm:$0xff] }
 0x2cd   : > { %v4722_v26 = vpop.f32.mrb[231].mxu0  ;;  %vm3460_vm5 = vcmp.lt.s32.totalorder %v3459_v34, 9  ;;  %vm3481_vm6 = vcmp.eq.s32.totalorder %v3459_v34, 9 }
 0x2d2   : > { %v3037_v42 = vpop.f32.mrb[232].mxu0 }
 0x2d3   : > { %v3072_v16 = vadd.f32 %v3037_v42, %v2791_v10  ;;  %v4725_v11 = vpop.f32.mrb[233].mxu0 }
 0x2d4   : > { %v3040_v31 = vpop.f32.mrb[234].mxu0 }
 0x2d5   : > { %v3097_v45 = vadd.f32 %v6124_v20, %v3072_v16  ;;  %v3073_v1 = vadd.f32 %v3040_v31, %v2792_v30  ;;  %v4726_v51 = vpop.f32.mrb[235].mxu0 }
 0x2d7   : > { %v3115_v60 = vmax.f32 %v3097_v45, 0.0  ;;  %v3098_v49 = vadd.f32 %v6124_v20, %v3073_v1 }
 0x2d9   : > { %v3131_v56 = vadd.f32 %v3129_v28, %v3115_v60  ;;  %v3116_v47 = vmax.f32 %v3098_v49, 0.0 }
 0x2da   : > { %v3045_v21 = vpop.f32.mrb[236].mxu0 }
 0x2db   : > { %v3132_v8 = vadd.f32 %v3130_v61, %v3116_v47  ;;  %v3074_v41 = vadd.f32 %v3045_v21, %v2793_v24  ;;  %v4729_v54 = vpop.f32.mrb[237].mxu0 }
 0x2dc   : > { %v3048_v5 = vpop.f32.mrb[238].mxu0 }
 0x2dd   : > { %v3099_v9 = vadd.f32 %v6124_v20, %v3074_v41  ;;  %v3075_v23 = vadd.f32 %v3048_v5, %v2794_v39  ;;  %v4730_v10 = vpop.f32.mrb[239].mxu0 }
 0x2df   : > { %v3117_v6 = vmax.f32 %v3099_v9, 0.0  ;;  %v3100_v14 = vadd.f32 %v6124_v20, %v3075_v23 }
 0x2e1   : > { %v3133_v35 = vadd.f32 %v3131_v56, %v3117_v6  ;;  %v3118_v30 = vmax.f32 %v3100_v14, 0.0 }
 0x2e2   : > { %v3053_v44 = vpop.f32.mrb[240].mxu0 }
 0x2e3   : > { %v3134_v19 = vadd.f32 %v3132_v8, %v3118_v30  ;;  %v3076_v48 = vadd.f32 %v3053_v44, %v2795_v29  ;;  %v4733_v7 = vpop.f32.mrb[241].mxu0  ;;  %v4087_v29 = vld [vmem:[%s6264_s5 + $0x8] sm:$0xff]  }
 0x2e4   : > { %v3056_v63 = vpop.f32.mrb[242].mxu0 }
 0x2e5   : > { %v3101_v37 = vadd.f32 %v6124_v20, %v3076_v48  ;;  %v3077_v50 = vadd.f32 %v3056_v63, %v2796_v32  ;;  %v4734_v24 = vpop.f32.mrb[243].mxu0 }
 0x2e7   : > { %v3119_v38 = vmax.f32 %v3101_v37, 0.0  ;;  %v3102_v43 = vadd.f32 %v6124_v20, %v3077_v50  ;;  %v4088_v20 = vld [vmem:[%s6264_s5 + $0x10] sm:$0xff]  }
 0x2e9   : > { %v3135_v46 = vadd.f32 %v3133_v35, %v3119_v38  ;;  %v3120_v39 = vmax.f32 %v3102_v43, 0.0 }
 0x2eb   : > { %v3137_v17 = vmul.f32 0.11111111, %v3135_v46  ;;  %v3136_v4 = vadd.f32 %v3134_v19, %v3120_v39 }
 0x2ed   : > { %v3138_v27 = vmul.f32 0.11111111, %v3136_v4  ;;  %4751 = vmatprep.mubr.msk.f32.mxu1 %vm3178_vm4, %v3137_v17 }
 0x2ef   : > { %4752 = vmatmul.mubr.msk.f32.vlgmr.msra.gmra.mrb[224].mxu1 %vm3178_vm4, %v3138_v27 }
 0x2f0   : > { %4811 = vmatpush3.bf16.msra.mxu1 %v6104_v13  ;;  %v4020_v13 = vld [vmem:[%s6263_s4] ss:$0 sm:$0xff] }
 0x2f1   : > { %4813 = vmatprep.subr.bf16.mxu1 %v4087_v29 }
 0x2f4   : > { %4815 = vmatpush3.bf16.msra.mxu1 %v4087_v29 }
 0x2f5   : > { %4817 = vmatprep.subr.bf16.mxu1 %v4088_v20 }
 0x2f8   : > { %4819 = vmatpush3.bf16.msra.mxu1 %v4088_v20 }
 0x2f9   : > { %4821 = vmatprep.subr.bf16.mxu1 %v4089_v57 }
 0x2fc   : > { %4823 = vmatpush3.bf16.msra.mxu1 %v4089_v57 }
 0x2fd   : > { %4825 = vmatprep.subr.bf16.mxu1 %v4069_v62 }
 0x3c2   : > { %v4753_v33 = vpop.f32.mrb[224].mxu1 }
 0x3c3   : > { %v3257_v40 = vadd.f32 %v4753_v33, %v4020_v13  ;;  %v3251_v18 = vpop.f32.mrb[225].mxu1 }
 0x3c4   : > { %v3252_v52 = vadd.f32 %v4020_v13, %v3251_v18 }
 0x3c5   : > { %v3261_v0 = vmax.f32 %v3257_v40, 0.0 }
 0x3c6   : > { %v3260_v32 = vmax.f32 %v3252_v52, 0.0 }
 0x3c8   : > { %4770 = vmatprep.mubr.msk.f32.mxu1 %vm3178_vm4, %v3260_v32 }
 0x3c9   : > { %4771 = vmatmul.mubr.msk.f32.vlgmr.msra.gmra.mrb[226].mxu1 %vm3178_vm4, %v3261_v0 }
 0x3ca   : > { %4827 = vmatpush3.bf16.msra.mxu1 %v4069_v62 }
 0x3cb   : > { %4829 = vmatprep.subr.bf16.mxu1 %v4090_v36 }
 0x3ce   : > { %4831 = vmatpush3.bf16.msra.mxu1 %v4090_v36 }
 0x3cf   : > { %4833 = vmatprep.subr.bf16.mxu1 %v4091_v53 }
 0x3d2   : > { %4835 = vmatpush3.bf16.msra.mxu1 %v4091_v53 }
 0x3d3   : > { %4837 = vmatprep.subr.bf16.mxu1 %v4092_v3 }
 0x3d6   : > { %4839 = vmatpush3.bf16.msra.mxu1 %v4092_v3 }
 0x49c   : > { %v4772_v25 = vpop.f32.mrb[226].mxu1 }
 0x49d   : > { %v3344_v28 = vadd.f32 %v4772_v25, %v3138_v27  ;;  %v3334_v12 = vpop.f32.mrb[227].mxu1 }
 0x49e   : > { %v3343_v61 = vadd.f32 %v3334_v12, %v3137_v17 }
 0x49f   : > { %v3353_v2 = vadd.f32 %v4025_v59, %v3344_v28 }
 0x4a0   : > { %v3352_v15 = vadd.f32 %v4025_v59, %v3343_v61 }
 0x4a2   : > { %4789 = vmatprep.mubr.msk.f32.mxu1 %vm3178_vm4, %v3352_v15 }
 0x4a3   : > { %4790 = vmatmul.mubr.msk.f32.vlgmr.msra.gmra.mrb[228].mxu1 %vm3178_vm4, %v3353_v2 }
 0x576   : > { %v4791_v58 = vpop.f32.mrb[228].mxu1 }
 0x577   : > { %v3449_v26 = vpop.f32.mrb[229].mxu1  ;;  %v3455_v16 = vadd.f32 %v4791_v58, %v4026_v22 }
 0x578   : > { %v3450_v42 = vadd.f32 %v4026_v22, %v3449_v26 }
 0x579   : > { %v3462_v31 = vsel %vm3460_vm5, %v3455_v16, -inf }
 0x57a   : > { %v3461_v11 = vsel %vm3460_vm5, %v3450_v42, -inf }
 0x57b   : > { %3463 = vmax.xlane.f32.xlu0 %v3461_v11 }
 0x57f   : > { %3465 = vmax.xlane.f32.xlu0 %v3462_v31 }
 0x608   : > { %v3464_v45 = vpop.xlane.xlu0 %3463 }
 0x609   : > { %v3467_v1 = vsub.f32 %v3461_v11, %v3464_v45 }
 0x60b   : > { %v3469_v51 = vmul.f32 1.442695, %v3467_v1 }
 0x60c   : > { %v3466_v60 = vpop.xlane.xlu0 %3465 }
 0x60d   : > { %5005 = vpow2.f32 %v3469_v51  ;;  %v3468_v49 = vsub.f32 %v3462_v31, %v3466_v60 }
 0x60f   : > { %v3471_v56 = vmul.f32 1.442695, %v3468_v49 }
 0x611   : > { %5007 = vpow2.f32 %v3471_v56 }
 0x617   : > { %v5006_v47 = vpop.eup %5005 }
 0x618   : > { %3473 = vadd.xlane.f32.xlu1 %v5006_v47 }
 0x61b   : > { %v5008_v21 = vpop.eup %5007 }
 0x61c   : > { %3475 = vadd.xlane.f32.xlu1 %v5008_v21 }
 0x6a5   : > { %v3474_v8 = vpop.xlane.xlu1 %3473 }
 0x6a6   : > { %5009 = vrcp.f32 %v3474_v8 }
 0x6a7   : > { %5011 = vtanh.f32 %v3450_v42 }
 0x6a9   : > { %v3476_v41 = vpop.xlane.xlu1 %3475 }
 0x6aa   : > { %5013 = vrcp.f32 %v3476_v41 }
 0x6ab   : > { %5015 = vtanh.f32 %v3455_v16 }
 0x6b0   : > { %v5010_v54 = vpop.eup %5009 }
 0x6b1   : > { %v3479_v5 = vmul.f32 %v5010_v54, %v5006_v47  ;;  %v5012_v9 = vpop.eup %5011 }
 0x6b3   : > { %v3484_v23 = vsel %vm3481_vm6, %v5012_v9, %v3479_v5 }
 0x6b4   : > { %v5014_v10 = vpop.eup %5013  ;;  %3486 = vst [vmem:[%s568_s28] sm:$0xff] %v3484_v23 }
 0x6b5   : > { %v3480_v6 = vmul.f32 %v5014_v10, %v5008_v21  ;;  %v5016_v14 = vpop.eup %5015 }
 0x6b7   : > { %v3485_v35 = vsel %vm3481_vm6, %v5016_v14, %v3480_v6 }
 0x6b8   : > { %3487 = vst [vmem:[%s568_s28 + $0x8] sm:$0xff] %v3485_v35 }
 0x6b9   : > { %5030 = shalt.err (!%p5027_p5)
}
 0x6ba   : > { %s5031_s26 = scalar_lea.hbm %s6213_s17, 256  ;;  %s5035_s29 = scalar_lea.hbm %s6268_s9, 512 }
 0x6bb   : > { %p5032_p7 = scmp.ne.s32.totalorder %s6213_s17, %s5031_s26  ;;  %p5036_p12 = scmp.lt.u32.totalorder %s6213_s17, %s6268_s9 }
 0x6bc   : > { %p5037_p13 = scmp.lt.u32.totalorder %s5035_s29, %s5031_s26  ;;  %p5039_p1 = scmp.lt.u32.totalorder %s5031_s26, %s6213_s17 }
 0x6bd   : > { %p5033_p10 = pnand %p5032_p7, %p5175_p6 }
 0x6be   : > { %p5038_p0 = por %p5037_p13, %p5036_p12 }
 0x6bf   : > { %p5034_p11 = pneg %p5033_p10 }
 0x6c0   : > { %p5040_p2 = por %p5039_p1, %p5038_p0 }
 0x6c2   : > { %p5041_p3 = pnand %p5040_p2, %p5034_p11 }
 0x6c4   : > { %5044 = shalt.err (!%p5041_p3)
}
 0x6c5   : > { %s5085_s21 = smov 128   ;;  %s5086_s23 = smov 8  }
 0x6c6   : > { %4844 = dma.vmem_to_hbm [thread:$0]  (%p5175_p6), %s6215_s24, 256, %s6213_s17, %s3489_s13, %s5085_s21, %s5085_s21, %s5086_s23  }
 0x6c7 PF: > { %s3517_s25 = sand.u32 1, %s5067_s30   ;;  %p4847_p4 = pnand %p3572_p9, %p5179_p8 }
 0x6c8   : > { %s3518_s26 = scalar_lea.sflag [#allocation4], %s3517_s25 }
 0x6c9   : > { %5062 = dma.done.wait (!%p4847_p4), %s3518_s26, 256  }
 0x6ca   : > { %5064 = vsyncadd (!%p4847_p4), %s3518_s26, 4294967040  ;;  %p19_p5 = scmp.ge.s32.totalorder %s5160_s15, 4   ;;  %s6271_s30 = smov %s5071_s10 }
 0x6cb   : > { %s6272_s10 = smov %s5075_s11  ;;  %s6273_s11 = smov %s5173_s18 }
 0x6cc   : > { %s6274_s12 = smov %s5160_s15  ;;  %21 = sbr.rel (!%p19_p5) target bundleno = 3 (0x3), region = 145 }
 0x6d3   :  { %3523 = vsyncpa [#allocation4], 1 }
 0x6d4   :  { %3525 = vsyncpa [#allocation4 + $0x1], 1 }

</bundles_post_ra>
